<compile_context>
chip_gen: v7x
topology: tpu7x:2x2x1
jax: 0.10.0
libtpu: 0.0.40
codegen_flags: <defaults>
</compile_context>

<pallas_src>
import math

import jax
import jax.numpy as jnp
from jax import lax
from jax.experimental import pallas as pl
from jax.experimental.pallas import tpu as pltpu


# ----------------------------- kernel helpers -----------------------------

def _silu(x):
    return x * jax.nn.sigmoid(x)


def _layernorm(x, w, b, eps):
    mu = jnp.mean(x, axis=-1, keepdims=True)
    var = jnp.mean((x - mu) ** 2, axis=-1, keepdims=True)
    return (x - mu) * lax.rsqrt(var + eps) * w + b


# --------------------------- attention kernel (grid = (B,)) ---------------------------

def _make_attn_kernel(S, D, H, HD, eps):
    def kernel(x_ref, mul_ref, add_ref, gate_ref,
               cos_ref, sin_ref,
               ln1_w_ref, ln1_b_ref,
               wq_ref, wk_ref, wv_ref, wo_ref,
               out_ref):
        x = x_ref[0]                                    # (S, D)

        nh = _layernorm(x, ln1_w_ref[...], ln1_b_ref[...], eps)
        # time + latent modulation pre-fused in the wrapper into one (mul, add)
        nh = nh * mul_ref[0] + add_ref[0]

        # qkv projections; 1/sqrt(HD) is folded into wq in the wrapper
        q = jnp.dot(nh, wq_ref[...], preferred_element_type=jnp.float32)
        k = jnp.dot(nh, wk_ref[...], preferred_element_type=jnp.float32)
        v = jnp.dot(nh, wv_ref[...], preferred_element_type=jnp.float32)

        cos = cos_ref[...]                              # (S, HD)
        sin = sin_ref[...]

        def rope(t):                                    # t: (S, HD)
            t1 = t[:, :HD // 2]
            t2 = t[:, HD // 2:]
            rot = jnp.concatenate([-t2, t1], axis=-1)
            return t * cos + rot * sin

        attn = jnp.zeros((S, D), jnp.float32)
        for h in range(H):                              # static unrolled per-head loop (2-D ops)
            sl = slice(h * HD, (h + 1) * HD)
            qh = rope(q[:, sl])
            kh = rope(k[:, sl])
            vh = v[:, sl]
            # contract the last dim of both operands -> no explicit K transpose
            s = lax.dot_general(qh, kh, (((1,), (1,)), ((), ())),
                                preferred_element_type=jnp.float32)
            s = s - jnp.max(s, axis=-1, keepdims=True)
            p = jnp.exp(s)
            inv_l = pl.reciprocal(jnp.sum(p, axis=-1, keepdims=True))
            o_h = jnp.dot(p, vh, preferred_element_type=jnp.float32) * inv_l
            # accumulate the output projection per head (no head concatenate)
            attn = attn + jnp.dot(o_h, wo_ref[sl, :],
                                  preferred_element_type=jnp.float32)

        out_ref[0] = x + attn * gate_ref[0]             # fused (time*latent) msa gate

    return kernel


# ------------------------ MLP kernel (grid = (B, FF // TFF)) ------------------------

def _make_mlp_kernel(S, D, eps):
    def kernel(h1_ref, mul_ref, add_ref, gate_ref,
               ln2_w_ref, ln2_b_ref,
               gate_w_ref, up_w_ref, down_w_ref,
               out_ref, nh2_ref, acc_ref):
        f = pl.program_id(1)

        @pl.when(f == 0)
        def _():
            h1 = h1_ref[0]
            nh2 = _layernorm(h1, ln2_w_ref[...], ln2_b_ref[...], eps)
            nh2_ref[...] = nh2 * mul_ref[0] + add_ref[0]
            acc_ref[...] = jnp.zeros_like(acc_ref)

        nh2 = nh2_ref[...]
        g = jnp.dot(nh2, gate_w_ref[...], preferred_element_type=jnp.float32)
        u = jnp.dot(nh2, up_w_ref[...], preferred_element_type=jnp.float32)
        acc_ref[...] += jnp.dot(_silu(g) * u, down_w_ref[...],
                                preferred_element_type=jnp.float32)

        @pl.when(f == pl.num_programs(1) - 1)
        def _():
            out_ref[0] = h1_ref[0] + acc_ref[...] * gate_ref[0]

    return kernel


# ------------------------------ wrapper ------------------------------

def _pick_ff_tile(ff):
    if ff <= 512:
        return ff
    for t in (512, 384, 256, 128):
        if ff % t == 0:
            return t
    return ff


def basic_transformer_block(hidden_states, attention_mask, z_latents,
                            time_shift_msa, time_scale_msa, time_gate_msa,
                            time_shift_mlp, time_scale_mlp, time_gate_mlp,
                            params, *, num_heads, eps=1e-5):
    # attention_mask is accepted for signature parity but unused: the reference module
    # calls scaled_dot_product_attention with attn_mask=None.
    del attention_mask
    B, S, D = hidden_states.shape
    HD = D // num_heads
    FF = params["gate_w"].shape[1]
    f32 = jnp.float32

    x = hidden_states.astype(f32)

    # --- glue computed once in XLA (hoisted out of the kernels) ---
    # latent modulation for all batches at once: SiLU(z) @ W + b   (B, 6D)
    mod = (jnp.dot(_silu(z_latents.astype(f32)), params["mod_w"].astype(f32))
           + params["mod_b"].astype(f32))
    (l_shift_msa, l_scale_msa, l_gate_msa,
     l_shift_mlp, l_scale_mlp, _l_gate_mlp) = jnp.split(mod, 6, axis=-1)

    # fuse time + latent modulation:
    #   modulate(modulate(y, ts, tc), ls, lc) = y*(1+tc)*(1+lc) + ts*(1+lc) + ls
    msa_mul = (1.0 + time_scale_msa) * (1.0 + l_scale_msa)
    msa_add = time_shift_msa * (1.0 + l_scale_msa) + l_shift_msa
    msa_gate = time_gate_msa * l_gate_msa
    mlp_mul = (1.0 + time_scale_mlp) * (1.0 + l_scale_mlp)
    mlp_add = time_shift_mlp * (1.0 + l_scale_mlp) + l_shift_mlp
    mlp_gate = time_gate_mlp        # latent_gate_mlp is unused in the reference module

    def rows(a):                    # (B, D) -> (B, 1, D): block shapes then obey (8,128)
        return a.astype(f32).reshape(B, 1, D)

    msa_mul, msa_add, msa_gate = rows(msa_mul), rows(msa_add), rows(msa_gate)
    mlp_mul, mlp_add, mlp_gate = rows(mlp_mul), rows(mlp_add), rows(mlp_gate)

    # RoPE tables (position_ids = arange(S), llama rope_theta = 10000)
    inv_freq = 1.0 / (10000.0 ** (jnp.arange(0, HD, 2, dtype=f32) / HD))
    pos = jnp.arange(S, dtype=f32)
    freqs = pos[:, None] * inv_freq[None, :]
    emb = jnp.concatenate([freqs, freqs], axis=-1)
    cos = jnp.cos(emb)
    sin = jnp.sin(emb)

    # fold the 1/sqrt(HD) attention scale into wq (RoPE is linear in q)
    wq = params["wq"].astype(f32) * (1.0 / math.sqrt(HD))
    wk = params["wk"].astype(f32)
    wv = params["wv"].astype(f32)
    wo = params["wo"].astype(f32)

    def const_spec(shape):
        nd = len(shape)
        # constant block index -> Pallas skips re-DMA across grid steps
        return pl.BlockSpec(shape, lambda *_: (0,) * nd)

    vmem_limit = 48 * 1024 * 1024

    # ---------------- kernel A: attention half ----------------
    batch_spec_a = pl.BlockSpec((1, S, D), lambda b: (b, 0, 0))
    row_spec_a = pl.BlockSpec((1, 1, D), lambda b: (b, 0, 0))

    h1 = pl.pallas_call(
        _make_attn_kernel(S, D, num_heads, HD, eps),
        out_shape=jax.ShapeDtypeStruct((B, S, D), f32),
        grid=(B,),
        in_specs=[
            batch_spec_a, row_spec_a, row_spec_a, row_spec_a,
            const_spec((S, HD)), const_spec((S, HD)),
            const_spec((1, D)), const_spec((1, D)),
            const_spec((D, D)), const_spec((D, D)),
            const_spec((D, D)), const_spec((D, D)),
        ],
        out_specs=batch_spec_a,
        compiler_params=pltpu.CompilerParams(
            dimension_semantics=("parallel",),
            vmem_limit_bytes=vmem_limit),
    )(x, msa_mul, msa_add, msa_gate, cos, sin,
      params["ln1_w"].astype(f32), params["ln1_b"].astype(f32),
      wq, wk, wv, wo)

    # ---------------- kernel B: MLP half, FF-dimension tiled (reduction axis last) ----------------
    TFF = _pick_ff_tile(FF)
    assert FF % TFF == 0
    n_f = FF // TFF

    batch_spec_b = pl.BlockSpec((1, S, D), lambda b, f: (b, 0, 0))
    row_spec_b = pl.BlockSpec((1, 1, D), lambda b, f: (b, 0, 0))

    out = pl.pallas_call(
        _make_mlp_kernel(S, D, eps),
        out_shape=jax.ShapeDtypeStruct((B, S, D), f32),
        grid=(B, n_f),
        in_specs=[
            batch_spec_b, row_spec_b, row_spec_b, row_spec_b,
            const_spec((1, D)), const_spec((1, D)),
            pl.BlockSpec((D, TFF), lambda b, f: (0, f)),   # gate_proj N-tile
            pl.BlockSpec((D, TFF), lambda b, f: (0, f)),   # up_proj   N-tile
            pl.BlockSpec((TFF, D), lambda b, f: (f, 0)),   # down_proj K-tile
        ],
        out_specs=batch_spec_b,
        scratch_shapes=[pltpu.VMEM((S, D), f32),           # nh2 (computed once per batch)
                        pltpu.VMEM((S, D), f32)],          # ff accumulator
        compiler_params=pltpu.CompilerParams(
            dimension_semantics=("parallel", "arbitrary"),
            vmem_limit_bytes=vmem_limit),
    )(h1, mlp_mul, mlp_add, mlp_gate,
      params["ln2_w"].astype(f32), params["ln2_b"].astype(f32),
      params["gate_w"].astype(f32), params["up_w"].astype(f32),
      params["down_w"].astype(f32))

    return out


# ------------------------- pure-JAX reference -------------------------

def ref_forward(x, z, tsm, tscm, tgm, tsl, tscl, tgl, p, H, eps=1e-5):
    B, S, D = x.shape
    HD = D // H

    def ln(y, w, b):
        mu = jnp.mean(y, -1, keepdims=True)
        var = jnp.mean((y - mu) ** 2, -1, keepdims=True)
        return (y - mu) / jnp.sqrt(var + eps) * w + b

    def silu(y):
        return y * jax.nn.sigmoid(y)

    def modulate(y, shift, scale):
        return y * (1.0 + scale[:, None, :]) + shift[:, None, :]

    mod = jnp.dot(silu(z), p["mod_w"]) + p["mod_b"]
    ls_msa, lsc_msa, lg_msa, ls_mlp, lsc_mlp, _ = jnp.split(mod, 6, axis=-1)

    nh = modulate(ln(x, p["ln1_w"], p["ln1_b"]), tsm, tscm)
    nh = modulate(nh, ls_msa, lsc_msa)

    q = (nh @ p["wq"]).reshape(B, S, H, HD).transpose(0, 2, 1, 3)
    k = (nh @ p["wk"]).reshape(B, S, H, HD).transpose(0, 2, 1, 3)
    v = (nh @ p["wv"]).reshape(B, S, H, HD).transpose(0, 2, 1, 3)

    inv_freq = 1.0 / (10000.0 ** (jnp.arange(0, HD, 2, dtype=jnp.float32) / HD))
    pos = jnp.arange(S, dtype=jnp.float32)
    freqs = pos[:, None] * inv_freq[None, :]
    emb = jnp.concatenate([freqs, freqs], axis=-1)
    cos = jnp.cos(emb)[None, None]
    sin = jnp.sin(emb)[None, None]

    def rot_half(t):
        t1, t2 = t[..., :HD // 2], t[..., HD // 2:]
        return jnp.concatenate([-t2, t1], axis=-1)

    q = q * cos + rot_half(q) * sin
    k = k * cos + rot_half(k) * sin

    s = jnp.einsum("bhqd,bhkd->bhqk", q, k) / math.sqrt(HD)
    pr = jax.nn.softmax(s, axis=-1)
    o = jnp.einsum("bhqk,bhkd->bhqd", pr, v).transpose(0, 2, 1, 3).reshape(B, S, D)
    attn = o @ p["wo"]
    attn = attn * tgm[:, None, :] * lg_msa[:, None, :]
    h1 = x + attn

    nh2 = modulate(ln(h1, p["ln2_w"], p["ln2_b"]), tsl, tscl)
    nh2 = modulate(nh2, ls_mlp, lsc_mlp)
    ff = (silu(nh2 @ p["gate_w"]) * (nh2 @ p["up_w"])) @ p["down_w"]
    return h1 + ff * tgl[:, None, :]


# ------------------------------- main -------------------------------

if __name__ == "__main__":
    B, S, D, H = 2, 8, 32, 4          # batch, seq, hidden dim, attention heads
    Z = 32                            # num_embeds_ada_norm
    FF = 4 * D                        # LlamaMLP intermediate size

    key = jax.random.PRNGKey(0)
    ks = jax.random.split(key, 20)

    # deterministic synthetic parameters (all weights (in, out); LN = ones/zeros)
    params = {
        "mod_w": 0.02 * jax.random.normal(ks[0], (Z, 6 * D), jnp.float32),
        "mod_b": 0.02 * jax.random.normal(ks[1], (1, 6 * D), jnp.float32),
        "ln1_w": jnp.ones((1, D), jnp.float32),
        "ln1_b": jnp.zeros((1, D), jnp.float32),
        "wq": 0.05 * jax.random.normal(ks[2], (D, D), jnp.float32),
        "wk": 0.05 * jax.random.normal(ks[3], (D, D), jnp.float32),
        "wv": 0.05 * jax.random.normal(ks[4], (D, D), jnp.float32),
        "wo": 0.05 * jax.random.normal(ks[5], (D, D), jnp.float32),
        "ln2_w": jnp.ones((1, D), jnp.float32),
        "ln2_b": jnp.zeros((1, D), jnp.float32),
        "gate_w": 0.05 * jax.random.normal(ks[6], (D, FF), jnp.float32),
        "up_w": 0.05 * jax.random.normal(ks[7], (D, FF), jnp.float32),
        "down_w": 0.05 * jax.random.normal(ks[8], (FF, D), jnp.float32),
    }

    hidden_states = jax.random.normal(ks[9], (B, S, D), jnp.float32)
    z_latents = jax.random.normal(ks[10], (B, Z), jnp.float32)
    time_shift_msa = 0.1 * jax.random.normal(ks[11], (B, D), jnp.float32)
    time_scale_msa = 0.1 * jax.random.normal(ks[12], (B, D), jnp.float32)
    time_gate_msa = 0.1 * jax.random.normal(ks[13], (B, D), jnp.float32)
    time_shift_mlp = 0.1 * jax.random.normal(ks[14], (B, D), jnp.float32)
    time_scale_mlp = 0.1 * jax.random.normal(ks[15], (B, D), jnp.float32)
    time_gate_mlp = 0.1 * jax.random.normal(ks[16], (B, D), jnp.float32)

    out = basic_transformer_block(
        hidden_states, None, z_latents,
        time_shift_msa, time_scale_msa, time_gate_msa,
        time_shift_mlp, time_scale_mlp, time_gate_mlp,
        params, num_heads=H)
    out = jax.block_until_ready(out)

    ref = ref_forward(hidden_states, z_latents,
                      time_shift_msa, time_scale_msa, time_gate_msa,
                      time_shift_mlp, time_scale_mlp, time_gate_mlp,
                      params, H)
    ref = jax.block_until_ready(ref)

    assert out.shape == (B, S, D)
    assert jnp.allclose(out, ref, atol=1e-3, rtol=1e-3), float(jnp.max(jnp.abs(out - ref)))

    print("KERNEL_OK")
</pallas_src>

<mosaic_0001>
module attributes {stable_mosaic.version = 11 : i64} {
  func.func @kernel(%arg0: i32, %arg1: memref<1x8x32xf32, #tpu.memory_space<vmem>>, %arg2: memref<1x1x32xf32, #tpu.memory_space<vmem>>, %arg3: memref<1x1x32xf32, #tpu.memory_space<vmem>>, %arg4: memref<1x1x32xf32, #tpu.memory_space<vmem>>, %arg5: memref<8x8xf32, #tpu.memory_space<vmem>>, %arg6: memref<8x8xf32, #tpu.memory_space<vmem>>, %arg7: memref<1x32xf32, #tpu.memory_space<vmem>>, %arg8: memref<1x32xf32, #tpu.memory_space<vmem>>, %arg9: memref<32x32xf32, #tpu.memory_space<vmem>>, %arg10: memref<32x32xf32, #tpu.memory_space<vmem>>, %arg11: memref<32x32xf32, #tpu.memory_space<vmem>>, %arg12: memref<32x32xf32, #tpu.memory_space<vmem>>, %arg13: memref<1x8x32xf32, #tpu.memory_space<vmem>>) attributes {dimension_semantics = [#tpu.dimension_semantics<parallel>], iteration_bounds = array<i64: 2>, scalar_prefetch = 0 : i64, scratch_operands = 0 : i64, tpu.core_type = #tpu.core_type<tc>, window_params = [{transform_indices = @transform_0, window_bounds = array<i64: 1, 8, 32>}, {transform_indices = @transform_1, window_bounds = array<i64: 1, 1, 32>}, {transform_indices = @transform_2, window_bounds = array<i64: 1, 1, 32>}, {transform_indices = @transform_3, window_bounds = array<i64: 1, 1, 32>}, {pipeline_mode = #tpu.pipeline_mode<synchronous>, transform_indices = @transform_4, window_bounds = array<i64: 8, 8>}, {pipeline_mode = #tpu.pipeline_mode<synchronous>, transform_indices = @transform_5, window_bounds = array<i64: 8, 8>}, {pipeline_mode = #tpu.pipeline_mode<synchronous>, transform_indices = @transform_6, window_bounds = array<i64: 1, 32>}, {pipeline_mode = #tpu.pipeline_mode<synchronous>, transform_indices = @transform_7, window_bounds = array<i64: 1, 32>}, {pipeline_mode = #tpu.pipeline_mode<synchronous>, transform_indices = @transform_8, window_bounds = array<i64: 32, 32>}, {pipeline_mode = #tpu.pipeline_mode<synchronous>, transform_indices = @transform_9, window_bounds = array<i64: 32, 32>}, {pipeline_mode = #tpu.pipeline_mode<synchronous>, transform_indices = @transform_10, window_bounds = array<i64: 32, 32>}, {pipeline_mode = #tpu.pipeline_mode<synchronous>, transform_indices = @transform_11, window_bounds = array<i64: 32, 32>}, {transform_indices = @transform_12, window_bounds = array<i64: 1, 8, 32>}]} {
    %c0 = arith.constant 0 : index
    %c0_0 = arith.constant 0 : index
    %c0_1 = arith.constant 0 : index
    %0 = vector.load %arg1[%c0, %c0_0, %c0_1] : memref<1x8x32xf32, #tpu.memory_space<vmem>>, vector<1x8x32xf32>
    %1 = vector.shape_cast %0 : vector<1x8x32xf32> to vector<8x32xf32>
    %c0_2 = arith.constant 0 : index
    %c0_3 = arith.constant 0 : index
    %2 = vector.load %arg7[%c0_2, %c0_3] : memref<1x32xf32, #tpu.memory_space<vmem>>, vector<1x32xf32>
    %c0_4 = arith.constant 0 : index
    %c0_5 = arith.constant 0 : index
    %3 = vector.load %arg8[%c0_4, %c0_5] : memref<1x32xf32, #tpu.memory_space<vmem>>, vector<1x32xf32>
    %cst = arith.constant dense<0.000000e+00> : vector<8xf32>
    %4 = vector.multi_reduction <add>, %1, %cst [1] : vector<8x32xf32> to vector<8xf32>
    %5 = vector.shape_cast %4 : vector<8xf32> to vector<8x1xf32>
    %cst_6 = arith.constant 3.200000e+01 : f32
    %6 = vector.broadcast %cst_6 : f32 to vector<8x1xf32>
    %7 = arith.divf %5, %6 : vector<8x1xf32>
    %8 = vector.broadcast %7 : vector<8x1xf32> to vector<8x32xf32>
    %9 = arith.subf %1, %8 : vector<8x32xf32>
    %10 = arith.mulf %9, %9 : vector<8x32xf32>
    %cst_7 = arith.constant dense<0.000000e+00> : vector<8xf32>
    %11 = vector.multi_reduction <add>, %10, %cst_7 [1] : vector<8x32xf32> to vector<8xf32>
    %12 = vector.shape_cast %11 : vector<8xf32> to vector<8x1xf32>
    %cst_8 = arith.constant 3.200000e+01 : f32
    %13 = vector.broadcast %cst_8 : f32 to vector<8x1xf32>
    %14 = arith.divf %12, %13 : vector<8x1xf32>
    %15 = vector.broadcast %7 : vector<8x1xf32> to vector<8x32xf32>
    %16 = arith.subf %1, %15 : vector<8x32xf32>
    %cst_9 = arith.constant 9.99999974E-6 : f32
    %17 = vector.broadcast %cst_9 : f32 to vector<8x1xf32>
    %18 = arith.addf %14, %17 : vector<8x1xf32>
    %19 = math.rsqrt %18 : vector<8x1xf32>
    %20 = vector.broadcast %19 : vector<8x1xf32> to vector<8x32xf32>
    %21 = arith.mulf %16, %20 : vector<8x32xf32>
    %22 = vector.broadcast %2 : vector<1x32xf32> to vector<8x32xf32>
    %23 = arith.mulf %21, %22 : vector<8x32xf32>
    %24 = vector.broadcast %3 : vector<1x32xf32> to vector<8x32xf32>
    %25 = arith.addf %23, %24 : vector<8x32xf32>
    %c0_10 = arith.constant 0 : index
    %c0_11 = arith.constant 0 : index
    %c0_12 = arith.constant 0 : index
    %26 = vector.load %arg2[%c0_10, %c0_11, %c0_12] : memref<1x1x32xf32, #tpu.memory_space<vmem>>, vector<1x1x32xf32>
    %27 = vector.shape_cast %26 : vector<1x1x32xf32> to vector<1x32xf32>
    %28 = vector.broadcast %27 : vector<1x32xf32> to vector<8x32xf32>
    %29 = arith.mulf %25, %28 : vector<8x32xf32>
    %c0_13 = arith.constant 0 : index
    %c0_14 = arith.constant 0 : index
    %c0_15 = arith.constant 0 : index
    %30 = vector.load %arg3[%c0_13, %c0_14, %c0_15] : memref<1x1x32xf32, #tpu.memory_space<vmem>>, vector<1x1x32xf32>
    %31 = vector.shape_cast %30 : vector<1x1x32xf32> to vector<1x32xf32>
    %32 = vector.broadcast %31 : vector<1x32xf32> to vector<8x32xf32>
    %33 = arith.addf %29, %32 : vector<8x32xf32>
    %c0_16 = arith.constant 0 : index
    %c0_17 = arith.constant 0 : index
    %34 = vector.load %arg9[%c0_16, %c0_17] : memref<32x32xf32, #tpu.memory_space<vmem>>, vector<32x32xf32>
    %cst_18 = arith.constant dense<0.000000e+00> : vector<8x32xf32>
    %35 = tpu.matmul %33, %34, %cst_18 {dimension_numbers = #tpu.dot_dimension_numbers<[1], [0], [0], [1], [0, 0, 1, 1], [], []>} : vector<8x32xf32>, vector<32x32xf32>, vector<8x32xf32> -> vector<8x32xf32>
    %c0_19 = arith.constant 0 : index
    %c0_20 = arith.constant 0 : index
    %36 = vector.load %arg10[%c0_19, %c0_20] : memref<32x32xf32, #tpu.memory_space<vmem>>, vector<32x32xf32>
    %cst_21 = arith.constant dense<0.000000e+00> : vector<8x32xf32>
    %37 = tpu.matmul %33, %36, %cst_21 {dimension_numbers = #tpu.dot_dimension_numbers<[1], [0], [0], [1], [0, 0, 1, 1], [], []>} : vector<8x32xf32>, vector<32x32xf32>, vector<8x32xf32> -> vector<8x32xf32>
    %c0_22 = arith.constant 0 : index
    %c0_23 = arith.constant 0 : index
    %38 = vector.load %arg11[%c0_22, %c0_23] : memref<32x32xf32, #tpu.memory_space<vmem>>, vector<32x32xf32>
    %cst_24 = arith.constant dense<0.000000e+00> : vector<8x32xf32>
    %39 = tpu.matmul %33, %38, %cst_24 {dimension_numbers = #tpu.dot_dimension_numbers<[1], [0], [0], [1], [0, 0, 1, 1], [], []>} : vector<8x32xf32>, vector<32x32xf32>, vector<8x32xf32> -> vector<8x32xf32>
    %c0_25 = arith.constant 0 : index
    %c0_26 = arith.constant 0 : index
    %40 = vector.load %arg5[%c0_25, %c0_26] : memref<8x8xf32, #tpu.memory_space<vmem>>, vector<8x8xf32>
    %c0_27 = arith.constant 0 : index
    %c0_28 = arith.constant 0 : index
    %41 = vector.load %arg6[%c0_27, %c0_28] : memref<8x8xf32, #tpu.memory_space<vmem>>, vector<8x8xf32>
    %cst_29 = arith.constant 0.000000e+00 : f32
    %42 = vector.broadcast %cst_29 : f32 to vector<8x32xf32>
    %43 = vector.extract_strided_slice %35 {offsets = [0, 0], sizes = [8, 8], strides = [1, 1]} : vector<8x32xf32> to vector<8x8xf32>
    %44 = vector.extract_strided_slice %43 {offsets = [0, 0], sizes = [8, 4], strides = [1, 1]} : vector<8x8xf32> to vector<8x4xf32>
    %45 = vector.extract_strided_slice %43 {offsets = [0, 4], sizes = [8, 4], strides = [1, 1]} : vector<8x8xf32> to vector<8x4xf32>
    %cst_30 = arith.constant 0.000000e+00 : f32
    %46 = vector.broadcast %cst_30 : f32 to vector<8x4xf32>
    %47 = arith.subf %46, %45 : vector<8x4xf32>
    %48 = tpu.concatenate %47, %44 in 1 : vector<8x4xf32>, vector<8x4xf32> -> vector<8x8xf32>
    %49 = arith.mulf %43, %40 : vector<8x8xf32>
    %50 = arith.mulf %48, %41 : vector<8x8xf32>
    %51 = arith.addf %49, %50 : vector<8x8xf32>
    %52 = vector.extract_strided_slice %37 {offsets = [0, 0], sizes = [8, 8], strides = [1, 1]} : vector<8x32xf32> to vector<8x8xf32>
    %53 = vector.extract_strided_slice %52 {offsets = [0, 0], sizes = [8, 4], strides = [1, 1]} : vector<8x8xf32> to vector<8x4xf32>
    %54 = vector.extract_strided_slice %52 {offsets = [0, 4], sizes = [8, 4], strides = [1, 1]} : vector<8x8xf32> to vector<8x4xf32>
    %cst_31 = arith.constant 0.000000e+00 : f32
    %55 = vector.broadcast %cst_31 : f32 to vector<8x4xf32>
    %56 = arith.subf %55, %54 : vector<8x4xf32>
    %57 = tpu.concatenate %56, %53 in 1 : vector<8x4xf32>, vector<8x4xf32> -> vector<8x8xf32>
    %58 = arith.mulf %52, %40 : vector<8x8xf32>
    %59 = arith.mulf %57, %41 : vector<8x8xf32>
    %60 = arith.addf %58, %59 : vector<8x8xf32>
    %61 = vector.extract_strided_slice %39 {offsets = [0, 0], sizes = [8, 8], strides = [1, 1]} : vector<8x32xf32> to vector<8x8xf32>
    %cst_32 = arith.constant dense<0.000000e+00> : vector<8x8xf32>
    %62 = tpu.matmul %51, %60, %cst_32 {dimension_numbers = #tpu.dot_dimension_numbers<[1], [1], [0], [0], [0, 0, 1, 0], [], []>} : vector<8x8xf32>, vector<8x8xf32>, vector<8x8xf32> -> vector<8x8xf32>
    %cst_33 = arith.constant dense<0xFF800000> : vector<8xf32>
    %63 = vector.multi_reduction <maximumf>, %62, %cst_33 [1] : vector<8x8xf32> to vector<8xf32>
    %64 = vector.shape_cast %63 : vector<8xf32> to vector<8x1xf32>
    %65 = vector.broadcast %64 : vector<8x1xf32> to vector<8x8xf32>
    %66 = arith.subf %62, %65 : vector<8x8xf32>
    %67 = math.exp %66 : vector<8x8xf32>
    %cst_34 = arith.constant dense<0.000000e+00> : vector<8xf32>
    %68 = vector.multi_reduction <add>, %67, %cst_34 [1] : vector<8x8xf32> to vector<8xf32>
    %69 = vector.shape_cast %68 : vector<8xf32> to vector<8x1xf32>
    %70 = tpu.reciprocal %69 : vector<8x1xf32> -> vector<8x1xf32>
    %cst_35 = arith.constant dense<0.000000e+00> : vector<8x8xf32>
    %71 = tpu.matmul %67, %61, %cst_35 {dimension_numbers = #tpu.dot_dimension_numbers<[1], [0], [0], [1], [0, 0, 1, 1], [], []>} : vector<8x8xf32>, vector<8x8xf32>, vector<8x8xf32> -> vector<8x8xf32>
    %72 = vector.broadcast %70 : vector<8x1xf32> to vector<8x8xf32>
    %73 = arith.mulf %71, %72 : vector<8x8xf32>
    %c0_36 = arith.constant 0 : index
    %c0_37 = arith.constant 0 : index
    %74 = vector.load %arg12[%c0_36, %c0_37] : memref<32x32xf32, #tpu.memory_space<vmem>>, vector<8x32xf32>
    %cst_38 = arith.constant dense<0.000000e+00> : vector<8x32xf32>
    %75 = tpu.matmul %73, %74, %cst_38 {dimension_numbers = #tpu.dot_dimension_numbers<[1], [0], [0], [1], [0, 0, 1, 1], [], []>} : vector<8x8xf32>, vector<8x32xf32>, vector<8x32xf32> -> vector<8x32xf32>
    %76 = arith.addf %42, %75 : vector<8x32xf32>
    %77 = vector.extract_strided_slice %35 {offsets = [0, 8], sizes = [8, 8], strides = [1, 1]} : vector<8x32xf32> to vector<8x8xf32>
    %78 = vector.extract_strided_slice %77 {offsets = [0, 0], sizes = [8, 4], strides = [1, 1]} : vector<8x8xf32> to vector<8x4xf32>
    %79 = vector.extract_strided_slice %77 {offsets = [0, 4], sizes = [8, 4], strides = [1, 1]} : vector<8x8xf32> to vector<8x4xf32>
    %cst_39 = arith.constant 0.000000e+00 : f32
    %80 = vector.broadcast %cst_39 : f32 to vector<8x4xf32>
    %81 = arith.subf %80, %79 : vector<8x4xf32>
    %82 = tpu.concatenate %81, %78 in 1 : vector<8x4xf32>, vector<8x4xf32> -> vector<8x8xf32>
    %83 = arith.mulf %77, %40 : vector<8x8xf32>
    %84 = arith.mulf %82, %41 : vector<8x8xf32>
    %85 = arith.addf %83, %84 : vector<8x8xf32>
    %86 = vector.extract_strided_slice %37 {offsets = [0, 8], sizes = [8, 8], strides = [1, 1]} : vector<8x32xf32> to vector<8x8xf32>
    %87 = vector.extract_strided_slice %86 {offsets = [0, 0], sizes = [8, 4], strides = [1, 1]} : vector<8x8xf32> to vector<8x4xf32>
    %88 = vector.extract_strided_slice %86 {offsets = [0, 4], sizes = [8, 4], strides = [1, 1]} : vector<8x8xf32> to vector<8x4xf32>
    %cst_40 = arith.constant 0.000000e+00 : f32
    %89 = vector.broadcast %cst_40 : f32 to vector<8x4xf32>
    %90 = arith.subf %89, %88 : vector<8x4xf32>
    %91 = tpu.concatenate %90, %87 in 1 : vector<8x4xf32>, vector<8x4xf32> -> vector<8x8xf32>
    %92 = arith.mulf %86, %40 : vector<8x8xf32>
    %93 = arith.mulf %91, %41 : vector<8x8xf32>
    %94 = arith.addf %92, %93 : vector<8x8xf32>
    %95 = vector.extract_strided_slice %39 {offsets = [0, 8], sizes = [8, 8], strides = [1, 1]} : vector<8x32xf32> to vector<8x8xf32>
    %cst_41 = arith.constant dense<0.000000e+00> : vector<8x8xf32>
    %96 = tpu.matmul %85, %94, %cst_41 {dimension_numbers = #tpu.dot_dimension_numbers<[1], [1], [0], [0], [0, 0, 1, 0], [], []>} : vector<8x8xf32>, vector<8x8xf32>, vector<8x8xf32> -> vector<8x8xf32>
    %cst_42 = arith.constant dense<0xFF800000> : vector<8xf32>
    %97 = vector.multi_reduction <maximumf>, %96, %cst_42 [1] : vector<8x8xf32> to vector<8xf32>
    %98 = vector.shape_cast %97 : vector<8xf32> to vector<8x1xf32>
    %99 = vector.broadcast %98 : vector<8x1xf32> to vector<8x8xf32>
    %100 = arith.subf %96, %99 : vector<8x8xf32>
    %101 = math.exp %100 : vector<8x8xf32>
    %cst_43 = arith.constant dense<0.000000e+00> : vector<8xf32>
    %102 = vector.multi_reduction <add>, %101, %cst_43 [1] : vector<8x8xf32> to vector<8xf32>
    %103 = vector.shape_cast %102 : vector<8xf32> to vector<8x1xf32>
    %104 = tpu.reciprocal %103 : vector<8x1xf32> -> vector<8x1xf32>
    %cst_44 = arith.constant dense<0.000000e+00> : vector<8x8xf32>
    %105 = tpu.matmul %101, %95, %cst_44 {dimension_numbers = #tpu.dot_dimension_numbers<[1], [0], [0], [1], [0, 0, 1, 1], [], []>} : vector<8x8xf32>, vector<8x8xf32>, vector<8x8xf32> -> vector<8x8xf32>
    %106 = vector.broadcast %104 : vector<8x1xf32> to vector<8x8xf32>
    %107 = arith.mulf %105, %106 : vector<8x8xf32>
    %c8 = arith.constant 8 : index
    %c0_45 = arith.constant 0 : index
    %108 = vector.load %arg12[%c8, %c0_45] : memref<32x32xf32, #tpu.memory_space<vmem>>, vector<8x32xf32>
    %cst_46 = arith.constant dense<0.000000e+00> : vector<8x32xf32>
    %109 = tpu.matmul %107, %108, %cst_46 {dimension_numbers = #tpu.dot_dimension_numbers<[1], [0], [0], [1], [0, 0, 1, 1], [], []>} : vector<8x8xf32>, vector<8x32xf32>, vector<8x32xf32> -> vector<8x32xf32>
    %110 = arith.addf %76, %109 : vector<8x32xf32>
    %111 = vector.extract_strided_slice %35 {offsets = [0, 16], sizes = [8, 8], strides = [1, 1]} : vector<8x32xf32> to vector<8x8xf32>
    %112 = vector.extract_strided_slice %111 {offsets = [0, 0], sizes = [8, 4], strides = [1, 1]} : vector<8x8xf32> to vector<8x4xf32>
    %113 = vector.extract_strided_slice %111 {offsets = [0, 4], sizes = [8, 4], strides = [1, 1]} : vector<8x8xf32> to vector<8x4xf32>
    %cst_47 = arith.constant 0.000000e+00 : f32
    %114 = vector.broadcast %cst_47 : f32 to vector<8x4xf32>
    %115 = arith.subf %114, %113 : vector<8x4xf32>
    %116 = tpu.concatenate %115, %112 in 1 : vector<8x4xf32>, vector<8x4xf32> -> vector<8x8xf32>
    %117 = arith.mulf %111, %40 : vector<8x8xf32>
    %118 = arith.mulf %116, %41 : vector<8x8xf32>
    %119 = arith.addf %117, %118 : vector<8x8xf32>
    %120 = vector.extract_strided_slice %37 {offsets = [0, 16], sizes = [8, 8], strides = [1, 1]} : vector<8x32xf32> to vector<8x8xf32>
    %121 = vector.extract_strided_slice %120 {offsets = [0, 0], sizes = [8, 4], strides = [1, 1]} : vector<8x8xf32> to vector<8x4xf32>
    %122 = vector.extract_strided_slice %120 {offsets = [0, 4], sizes = [8, 4], strides = [1, 1]} : vector<8x8xf32> to vector<8x4xf32>
    %cst_48 = arith.constant 0.000000e+00 : f32
    %123 = vector.broadcast %cst_48 : f32 to vector<8x4xf32>
    %124 = arith.subf %123, %122 : vector<8x4xf32>
    %125 = tpu.concatenate %124, %121 in 1 : vector<8x4xf32>, vector<8x4xf32> -> vector<8x8xf32>
    %126 = arith.mulf %120, %40 : vector<8x8xf32>
    %127 = arith.mulf %125, %41 : vector<8x8xf32>
    %128 = arith.addf %126, %127 : vector<8x8xf32>
    %129 = vector.extract_strided_slice %39 {offsets = [0, 16], sizes = [8, 8], strides = [1, 1]} : vector<8x32xf32> to vector<8x8xf32>
    %cst_49 = arith.constant dense<0.000000e+00> : vector<8x8xf32>
    %130 = tpu.matmul %119, %128, %cst_49 {dimension_numbers = #tpu.dot_dimension_numbers<[1], [1], [0], [0], [0, 0, 1, 0], [], []>} : vector<8x8xf32>, vector<8x8xf32>, vector<8x8xf32> -> vector<8x8xf32>
    %cst_50 = arith.constant dense<0xFF800000> : vector<8xf32>
    %131 = vector.multi_reduction <maximumf>, %130, %cst_50 [1] : vector<8x8xf32> to vector<8xf32>
    %132 = vector.shape_cast %131 : vector<8xf32> to vector<8x1xf32>
    %133 = vector.broadcast %132 : vector<8x1xf32> to vector<8x8xf32>
    %134 = arith.subf %130, %133 : vector<8x8xf32>
    %135 = math.exp %134 : vector<8x8xf32>
    %cst_51 = arith.constant dense<0.000000e+00> : vector<8xf32>
    %136 = vector.multi_reduction <add>, %135, %cst_51 [1] : vector<8x8xf32> to vector<8xf32>
    %137 = vector.shape_cast %136 : vector<8xf32> to vector<8x1xf32>
    %138 = tpu.reciprocal %137 : vector<8x1xf32> -> vector<8x1xf32>
    %cst_52 = arith.constant dense<0.000000e+00> : vector<8x8xf32>
    %139 = tpu.matmul %135, %129, %cst_52 {dimension_numbers = #tpu.dot_dimension_numbers<[1], [0], [0], [1], [0, 0, 1, 1], [], []>} : vector<8x8xf32>, vector<8x8xf32>, vector<8x8xf32> -> vector<8x8xf32>
    %140 = vector.broadcast %138 : vector<8x1xf32> to vector<8x8xf32>
    %141 = arith.mulf %139, %140 : vector<8x8xf32>
    %c16 = arith.constant 16 : index
    %c0_53 = arith.constant 0 : index
    %142 = vector.load %arg12[%c16, %c0_53] : memref<32x32xf32, #tpu.memory_space<vmem>>, vector<8x32xf32>
    %cst_54 = arith.constant dense<0.000000e+00> : vector<8x32xf32>
    %143 = tpu.matmul %141, %142, %cst_54 {dimension_numbers = #tpu.dot_dimension_numbers<[1], [0], [0], [1], [0, 0, 1, 1], [], []>} : vector<8x8xf32>, vector<8x32xf32>, vector<8x32xf32> -> vector<8x32xf32>
    %144 = arith.addf %110, %143 : vector<8x32xf32>
    %145 = vector.extract_strided_slice %35 {offsets = [0, 24], sizes = [8, 8], strides = [1, 1]} : vector<8x32xf32> to vector<8x8xf32>
    %146 = vector.extract_strided_slice %145 {offsets = [0, 0], sizes = [8, 4], strides = [1, 1]} : vector<8x8xf32> to vector<8x4xf32>
    %147 = vector.extract_strided_slice %145 {offsets = [0, 4], sizes = [8, 4], strides = [1, 1]} : vector<8x8xf32> to vector<8x4xf32>
    %cst_55 = arith.constant 0.000000e+00 : f32
    %148 = vector.broadcast %cst_55 : f32 to vector<8x4xf32>
    %149 = arith.subf %148, %147 : vector<8x4xf32>
    %150 = tpu.concatenate %149, %146 in 1 : vector<8x4xf32>, vector<8x4xf32> -> vector<8x8xf32>
    %151 = arith.mulf %145, %40 : vector<8x8xf32>
    %152 = arith.mulf %150, %41 : vector<8x8xf32>
    %153 = arith.addf %151, %152 : vector<8x8xf32>
    %154 = vector.extract_strided_slice %37 {offsets = [0, 24], sizes = [8, 8], strides = [1, 1]} : vector<8x32xf32> to vector<8x8xf32>
    %155 = vector.extract_strided_slice %154 {offsets = [0, 0], sizes = [8, 4], strides = [1, 1]} : vector<8x8xf32> to vector<8x4xf32>
    %156 = vector.extract_strided_slice %154 {offsets = [0, 4], sizes = [8, 4], strides = [1, 1]} : vector<8x8xf32> to vector<8x4xf32>
    %cst_56 = arith.constant 0.000000e+00 : f32
    %157 = vector.broadcast %cst_56 : f32 to vector<8x4xf32>
    %158 = arith.subf %157, %156 : vector<8x4xf32>
    %159 = tpu.concatenate %158, %155 in 1 : vector<8x4xf32>, vector<8x4xf32> -> vector<8x8xf32>
    %160 = arith.mulf %154, %40 : vector<8x8xf32>
    %161 = arith.mulf %159, %41 : vector<8x8xf32>
    %162 = arith.addf %160, %161 : vector<8x8xf32>
    %163 = vector.extract_strided_slice %39 {offsets = [0, 24], sizes = [8, 8], strides = [1, 1]} : vector<8x32xf32> to vector<8x8xf32>
    %cst_57 = arith.constant dense<0.000000e+00> : vector<8x8xf32>
    %164 = tpu.matmul %153, %162, %cst_57 {dimension_numbers = #tpu.dot_dimension_numbers<[1], [1], [0], [0], [0, 0, 1, 0], [], []>} : vector<8x8xf32>, vector<8x8xf32>, vector<8x8xf32> -> vector<8x8xf32>
    %cst_58 = arith.constant dense<0xFF800000> : vector<8xf32>
    %165 = vector.multi_reduction <maximumf>, %164, %cst_58 [1] : vector<8x8xf32> to vector<8xf32>
    %166 = vector.shape_cast %165 : vector<8xf32> to vector<8x1xf32>
    %167 = vector.broadcast %166 : vector<8x1xf32> to vector<8x8xf32>
    %168 = arith.subf %164, %167 : vector<8x8xf32>
    %169 = math.exp %168 : vector<8x8xf32>
    %cst_59 = arith.constant dense<0.000000e+00> : vector<8xf32>
    %170 = vector.multi_reduction <add>, %169, %cst_59 [1] : vector<8x8xf32> to vector<8xf32>
    %171 = vector.shape_cast %170 : vector<8xf32> to vector<8x1xf32>
    %172 = tpu.reciprocal %171 : vector<8x1xf32> -> vector<8x1xf32>
    %cst_60 = arith.constant dense<0.000000e+00> : vector<8x8xf32>
    %173 = tpu.matmul %169, %163, %cst_60 {dimension_numbers = #tpu.dot_dimension_numbers<[1], [0], [0], [1], [0, 0, 1, 1], [], []>} : vector<8x8xf32>, vector<8x8xf32>, vector<8x8xf32> -> vector<8x8xf32>
    %174 = vector.broadcast %172 : vector<8x1xf32> to vector<8x8xf32>
    %175 = arith.mulf %173, %174 : vector<8x8xf32>
    %c24 = arith.constant 24 : index
    %c0_61 = arith.constant 0 : index
    %176 = vector.load %arg12[%c24, %c0_61] : memref<32x32xf32, #tpu.memory_space<vmem>>, vector<8x32xf32>
    %cst_62 = arith.constant dense<0.000000e+00> : vector<8x32xf32>
    %177 = tpu.matmul %175, %176, %cst_62 {dimension_numbers = #tpu.dot_dimension_numbers<[1], [0], [0], [1], [0, 0, 1, 1], [], []>} : vector<8x8xf32>, vector<8x32xf32>, vector<8x32xf32> -> vector<8x32xf32>
    %178 = arith.addf %144, %177 : vector<8x32xf32>
    %c0_63 = arith.constant 0 : index
    %c0_64 = arith.constant 0 : index
    %c0_65 = arith.constant 0 : index
    %179 = vector.load %arg4[%c0_63, %c0_64, %c0_65] : memref<1x1x32xf32, #tpu.memory_space<vmem>>, vector<1x1x32xf32>
    %180 = vector.shape_cast %179 : vector<1x1x32xf32> to vector<1x32xf32>
    %181 = vector.broadcast %180 : vector<1x32xf32> to vector<8x32xf32>
    %182 = arith.mulf %178, %181 : vector<8x32xf32>
    %183 = arith.addf %1, %182 : vector<8x32xf32>
    %c0_66 = arith.constant 0 : index
    %c0_67 = arith.constant 0 : index
    %c0_68 = arith.constant 0 : index
    %184 = vector.load %arg13[%c0_66, %c0_67, %c0_68] : memref<1x8x32xf32, #tpu.memory_space<vmem>>, vector<1x8x32xf32>
    %185 = vector.shape_cast %184 : vector<1x8x32xf32> to vector<8x32xf32>
    %186 = vector.shape_cast %183 : vector<8x32xf32> to vector<1x8x32xf32>
    tpu.vector_store %arg13[%c0_66, %c0_67, %c0_68], %186 {strides = array<i32>} : memref<1x8x32xf32, #tpu.memory_space<vmem>>, vector<1x8x32xf32>,
    return
  }
  func.func @transform_0(%arg0: i32) -> (i32, i32, i32) {
    %c0_i32 = arith.constant 0 : i32
    %c0_i32_0 = arith.constant 0 : i32
    %c0_i32_1 = arith.constant 0 : i32
    return %arg0, %c0_i32, %c0_i32_0 : i32, i32, i32
  }
  func.func @transform_1(%arg0: i32) -> (i32, i32, i32) {
    %c0_i32 = arith.constant 0 : i32
    %c0_i32_0 = arith.constant 0 : i32
    %c0_i32_1 = arith.constant 0 : i32
    return %arg0, %c0_i32, %c0_i32_0 : i32, i32, i32
  }
  func.func @transform_2(%arg0: i32) -> (i32, i32, i32) {
    %c0_i32 = arith.constant 0 : i32
    %c0_i32_0 = arith.constant 0 : i32
    %c0_i32_1 = arith.constant 0 : i32
    return %arg0, %c0_i32, %c0_i32_0 : i32, i32, i32
  }
  func.func @transform_3(%arg0: i32) -> (i32, i32, i32) {
    %c0_i32 = arith.constant 0 : i32
    %c0_i32_0 = arith.constant 0 : i32
    %c0_i32_1 = arith.constant 0 : i32
    return %arg0, %c0_i32, %c0_i32_0 : i32, i32, i32
  }
  func.func @transform_4(%arg0: i32) -> (i32, i32) {
    %c0_i32 = arith.constant 0 : i32
    %c0_i32_0 = arith.constant 0 : i32
    %c0_i32_1 = arith.constant 0 : i32
    return %c0_i32, %c0_i32_0 : i32, i32
  }
  func.func @transform_5(%arg0: i32) -> (i32, i32) {
    %c0_i32 = arith.constant 0 : i32
    %c0_i32_0 = arith.constant 0 : i32
    %c0_i32_1 = arith.constant 0 : i32
    return %c0_i32, %c0_i32_0 : i32, i32
  }
  func.func @transform_6(%arg0: i32) -> (i32, i32) {
    %c0_i32 = arith.constant 0 : i32
    %c0_i32_0 = arith.constant 0 : i32
    %c0_i32_1 = arith.constant 0 : i32
    return %c0_i32, %c0_i32_0 : i32, i32
  }
  func.func @transform_7(%arg0: i32) -> (i32, i32) {
    %c0_i32 = arith.constant 0 : i32
    %c0_i32_0 = arith.constant 0 : i32
    %c0_i32_1 = arith.constant 0 : i32
    return %c0_i32, %c0_i32_0 : i32, i32
  }
  func.func @transform_8(%arg0: i32) -> (i32, i32) {
    %c0_i32 = arith.constant 0 : i32
    %c0_i32_0 = arith.constant 0 : i32
    %c0_i32_1 = arith.constant 0 : i32
    return %c0_i32, %c0_i32_0 : i32, i32
  }
  func.func @transform_9(%arg0: i32) -> (i32, i32) {
    %c0_i32 = arith.constant 0 : i32
    %c0_i32_0 = arith.constant 0 : i32
    %c0_i32_1 = arith.constant 0 : i32
    return %c0_i32, %c0_i32_0 : i32, i32
  }
  func.func @transform_10(%arg0: i32) -> (i32, i32) {
    %c0_i32 = arith.constant 0 : i32
    %c0_i32_0 = arith.constant 0 : i32
    %c0_i32_1 = arith.constant 0 : i32
    return %c0_i32, %c0_i32_0 : i32, i32
  }
  func.func @transform_11(%arg0: i32) -> (i32, i32) {
    %c0_i32 = arith.constant 0 : i32
    %c0_i32_0 = arith.constant 0 : i32
    %c0_i32_1 = arith.constant 0 : i32
    return %c0_i32, %c0_i32_0 : i32, i32
  }
  func.func @transform_12(%arg0: i32) -> (i32, i32, i32) {
    %c0_i32 = arith.constant 0 : i32
    %c0_i32_0 = arith.constant 0 : i32
    %c0_i32_1 = arith.constant 0 : i32
    return %arg0, %c0_i32, %c0_i32_0 : i32, i32, i32
  }
}

</mosaic_0001>

<bundles_post_ra>
// kernel: tpu_custom_call.1
= control target key start
LH: loop header
LB: loop body
LE: loop exit
PB: predicated region body
PF: predicated region fallthrough
CT: control target
= control target key end

     0   :  { %s3602_s0 = inlined_call_operand.hbm [shape: f32[2,8,32], index: 0, kind: input, shape index: {}]   ;;  %s3603_s1 = inlined_call_operand.vmem [shape: f32[2,1,32], index: 1, kind: input, shape index: {}]   ;;  %s3604_s2 = inlined_call_operand.hbm [shape: f32[2,1,32], index: 2, kind: input, shape index: {}]   ;;  %s3605_s3 = inlined_call_operand.hbm [shape: f32[2,1,32], index: 3, kind: input, shape index: {}]   ;;  %s3606_s4 = inlined_call_operand.hbm [shape: f32[8,8], index: 4, kind: input, shape index: {}]   ;;  %s3607_s5 = inlined_call_operand.hbm [shape: f32[8,8], index: 5, kind: input, shape index: {}]   ;;  %s3608_s6 = inlined_call_operand.hbm [shape: f32[1,32], index: 6, kind: input, shape index: {}]   ;;  %s3609_s7 = inlined_call_operand.hbm [shape: f32[1,32], index: 7, kind: input, shape index: {}]   ;;  %s3610_s8 = inlined_call_operand.hbm [shape: f32[32,32], index: 8, kind: input, shape index: {}]   ;;  %s3611_s9 = inlined_call_operand.vmem [shape: f32[32,32], index: 9, kind: input, shape index: {}]   ;;  %s3612_s10 = inlined_call_operand.hbm [shape: f32[32,32], index: 10, kind: input, shape index: {}]   ;;  %s3613_s11 = inlined_call_operand.hbm [shape: f32[32,32], index: 11, kind: input, shape index: {}]   ;;  %s3614_s12 = inlined_call_operand.hbm [shape: f32[2,8,32], index: 12, kind: output, shape index: {}]  }
   0x1   :  { %3640 = sst [smem:[#allocation33_spill]] %s3603_s1 }
   0x2   :  { %3641 = sst [smem:[#allocation34_spill]] %s3604_s2 }
   0x3   :  { %3642 = sst [smem:[#allocation35_spill]] %s3606_s4 }
   0x4   :  { %3643 = sst [smem:[#allocation36_spill]] %s3608_s6 }
   0x5   :  { %3644 = sst [smem:[#allocation37_spill]] %s3610_s8 }
   0x6   :  { %3645 = sst [smem:[#allocation38_spill]] %s3611_s9 }
   0x7   :  { %3646 = sst [smem:[#allocation39_spill]] %s3614_s12 }
   0x8   :  { %17 = vsyncpa [#allocation3], 0 }
   0x9   :  { %19 = vsyncpa [#allocation3 + $0x1], 0 }
   0xa   :  { %20 = vsyncpa [#allocation6], 0 }
   0xb   :  { %22 = vsyncpa [#allocation6 + $0x1], 0 }
   0xc   :  { %23 = vsyncpa [#allocation9], 0 }
   0xd   :  { %24 = vsyncpa [#allocation12], 0 }
   0xe   :  { %25 = vsyncpa [#allocation15], 0 }
   0xf   :  { %26 = vsyncpa [#allocation18], 0 }
  0x10   :  { %27 = vsyncpa [#allocation4], 0 }
  0x11   :  { %29 = vsyncpa [#allocation4 + $0x1], 0  ;;  %s3001_s21 = smov 0   ;;  %s3003_s22 = smov 0  }
  0x12   :  { %s3005_s23 = smov 0   ;;  %s3007_s24 = smov 0  }
  0x13 LB: > { %3647 = sst [smem:[#allocation27_spill]] %s2895_s21  ;;  %s2909_s25 = smov [#allocation8]   ;;  %s2907_s24 = sphi %s3007_s24, %s3692_s24   ;;  %s2903_s23 = sphi %s3005_s23, %s3694_s23   ;;  %s2899_s22 = sphi %s3003_s22, %s3696_s22   ;;  %s2895_s21 = sphi %s3001_s21, %s3695_s21  }
  0x14   : > { %3648 = sst [smem:[#allocation28_spill]] %s2903_s23  ;;  %s351_s26 = sshll.u32 %s2909_s25, 4  ;;  %s352_s26 = int_to_ptr.vmem [resolvable:$true] %s351_s26 }
  0x15   : > { %s3022_s27 = sadd.s32 4294967295, %s2907_s24   ;;  %p2167_p0 = scmp.ge.s32.totalorder %s2907_s24, 1 }
  0x16   : > { %p3615_p1 = scmp.eq.s32.totalorder %s3022_s27, 0  ;;  %p338_p2 = scmp.lt.s32.totalorder %s2907_s24, 3 }
  0x17   : > { %s2910_s29 = smov [#allocation11]   ;;  %s2911_s13 = smov [#allocation14]  }
  0x18   : > { %p3027_p3 = pnand %p2167_p0, %p338_p2  ;;  %s373_s30 = sshll.u32 %s2910_s29, 4  ;;  %s3034_s30 = int_to_ptr.vmem [resolvable:$true] %s373_s30 }
  0x19   : > { %s394_s14 = sshll.u32 %s2911_s13, 4  ;;  %s3651_s4 = sld [smem:[#allocation35_spill]]  ;;  %s3042_s14 = int_to_ptr.vmem [resolvable:$true] %s394_s14 }
  0x1a   : > { %s3649_s28 = scalar_select %p3027_p3, 1, 0 }
  0x1b   : > { %p2410_p5 = pneg %p3027_p3 }
  0x1d   : > { %p3038_p6 = pnand %p2410_p5, %p3615_p1 }
  0x1f   : > { %s3650_s15 = scalar_select %p3038_p6, 1, 0 }
  0x20   : > { %s2535_s18 = scalar_lea.hbm %s3651_s4, 128  ;;  %p3052_p8 = pneg %p3038_p6 }
  0x21   : > { %p2536_p7 = scmp.ne.s32.totalorder %s3651_s4, %s2535_s18  ;;  %p2542_p11 = scmp.lt.u32.totalorder %s2535_s18, %s3651_s4 }
  0x22   : > { %s3652_s25 = scalar_select %p3052_p8, 1, 0 }
  0x23   : > { %p2538_p9 = pnand %p3052_p8, %p2536_p7 }
  0x25   : > { %p2539_p10 = pneg %p2538_p9 }
  0x27   : > { %p2544_p12 = pnand %p2542_p11, %p2539_p10 }
  0x29   : > { %2547 = shalt.err (!%p2544_p12)
}
  0x2a   : > { %s2548_s16 = scalar_lea.vmem %s352_s26, 128  ;;  %p2556_p5 = scmp.lt.s32.totalorder %s352_s26, %s352_s26 }
  0x2b   : > { %p2549_p13 = scmp.ne.s32.totalorder %s352_s26, %s2548_s16  ;;  %p2557_p4 = scmp.lt.s32.totalorder %s2548_s16, %s2548_s16 }
  0x2d   : > { %p2551_p0 = pnand %p2549_p13, %p3052_p8  ;;  %p2558_p1 = por %p2557_p4, %p2556_p5 }
  0x2f   : > { %p2552_p2 = pneg %p2551_p0 }
  0x31   : > { %p2559_p3 = pnand %p2558_p1, %p2552_p2 }
  0x33   : > { %2562 = shalt.err (!%p2559_p3)
}
  0x34   : > { %2413 = dma.hbm_to_vmem [thread:$0]  (!%p3038_p6), %s3651_s4, 128, %s352_s26, [#allocation9]  }
  0x35   : > { %s3653_s6 = sld [smem:[#allocation36_spill]] }
  0x3b   : > { %s2563_s29 = scalar_lea.hbm %s3653_s6, 16 }
  0x3c   : > { %p2564_p7 = scmp.ne.s32.totalorder %s3653_s6, %s2563_s29  ;;  %p2570_p1 = scmp.lt.u32.totalorder %s2563_s29, %s3653_s6 }
  0x3e   : > { %p2566_p9 = pnand %p2564_p7, %p3052_p8 }
  0x40   : > { %p2567_p4 = pneg %p2566_p9 }
  0x42   : > { %p2572_p3 = pnand %p2570_p1, %p2567_p4 }
  0x44   : > { %2575 = shalt.err (!%p2572_p3)
}
  0x45   : > { %s2576_s26 = scalar_lea.vmem %s3034_s30, 16  ;;  %s2583_s12 = scalar_lea.vmem %s3034_s30, 32 }
  0x46   : > { %p2577_p10 = scmp.ne.s32.totalorder %s3034_s30, %s2576_s26  ;;  %p2584_p13 = scmp.lt.s32.totalorder %s3034_s30, %s3034_s30 }
  0x47   : > { %p2585_p0 = scmp.lt.s32.totalorder %s2583_s12, %s2576_s26 }
  0x48   : > { %p2579_p11 = pnand %p2577_p10, %p3052_p8 }
  0x49   : > { %p2586_p2 = por %p2585_p0, %p2584_p13 }
  0x4a   : > { %p2580_p12 = pneg %p2579_p11 }
  0x4c   : > { %p2587_p5 = pnand %p2586_p2, %p2580_p12 }
  0x4e   : > { %2590 = shalt.err (!%p2587_p5)
}
  0x4f   : > { %2419 = dma.hbm_to_vmem [thread:$0]  (!%p3038_p6), %s3653_s6, 16, %s3034_s30, [#allocation12]  }
  0x50   : > { %s3654_s8 = sld [smem:[#allocation37_spill]] }
  0x56   : > { %s2591_s20 = scalar_lea.hbm %s3654_s8, 512 }
  0x57   : > { %p2592_p7 = scmp.ne.s32.totalorder %s3654_s8, %s2591_s20  ;;  %p2598_p1 = scmp.lt.u32.totalorder %s2591_s20, %s3654_s8 }
  0x59   : > { %p2594_p9 = pnand %p2592_p7, %p3052_p8 }
  0x5b   : > { %p2595_p4 = pneg %p2594_p9 }
  0x5d   : > { %p2600_p3 = pnand %p2598_p1, %p2595_p4 }
  0x5f   : > { %2603 = shalt.err (!%p2600_p3)
}
  0x60   : > { %s2604_s30 = scalar_lea.vmem %s3042_s14, 512  ;;  %p2612_p13 = scmp.lt.s32.totalorder %s3042_s14, %s3042_s14 }
  0x61   : > { %p2605_p10 = scmp.ne.s32.totalorder %s3042_s14, %s2604_s30  ;;  %p2613_p0 = scmp.lt.s32.totalorder %s2604_s30, %s2604_s30 }
  0x63   : > { %p2607_p11 = pnand %p2605_p10, %p3052_p8  ;;  %p2614_p2 = por %p2613_p0, %p2612_p13 }
  0x65   : > { %p2608_p12 = pneg %p2607_p11 }
  0x67   : > { %p2615_p5 = pnand %p2614_p2, %p2608_p12 }
  0x69   : > { %2618 = shalt.err (!%p2615_p5)
}
  0x6a   : > { %s3618_s12 = smov 128   ;;  %s3620_s1 = smov 8  }
  0x6b   : > { %2425 = dma.hbm_to_vmem [thread:$0]  (!%p3038_p6), %s3654_s8, 512, %s3042_s14, [#allocation15], %s3618_s12, %s3618_s12, %s3620_s1  }
  0x6c   : > { %s2166_s18 = sadd.s32 4294967294, %s2907_s24   ;;  %s3120_s20 = sadd.s32 1, %s2907_s24  }
  0x6d   : > { %3655 = sst [smem:[#allocation29_spill]] %s3120_s20  ;;  %s42_s29 = sadd.s32 1, %s2903_s23 }
  0x6e   : > { %s39_s13 = ssub.s32 %s2907_s24, %s3120_s20  ;;  %p49_p7 = scmp.ne.s32.totalorder %s2903_s23, %s2899_s22 }
  0x6f   : > { %p40_p9 = scmp.eq.s32.totalorder %s39_s13, 0  ;;  %p50_p4 = scmp.eq.s32.totalorder %s2907_s24, 0 }
  0x70   : > { %p55_p1 = scmp.ne.s32.totalorder %s2899_s22, %s2895_s21  ;;  %p325_p3 = scmp.eq.s32.totalorder %s3022_s27, 1 }
  0x71   : > { %s3132_s16 = scalar_select %p40_p9, %s2903_s23, %s42_s29  }
  0x72   : > { %p51_p10 = por %p50_p4, %p49_p7  ;;  %p3657_p11 = scmp.eq.s32.totalorder %s3022_s27, 0 }
  0x73   : > { %3656 = sst [smem:[#allocation30_spill]] %s3132_s16  ;;  %p3140_p13 = por %p325_p3, %p49_p7 }
  0x74   : > { %p3136_p12 = por %p3657_p11, %p55_p1  ;;  %p331_p0 = scmp.eq.s32.totalorder %s2166_s18, 1 }
  0x75   : > { %s3659_s26 = scalar_select %p3140_p13, 1, 0 }
  0x76   : > { %s3658_s14 = scalar_select %p3136_p12, 1, 0 }
  0x77   : > { %3660 = sst [smem:[#allocation31_spill]] %s3659_s26  ;;  %p2453_p2 = scmp.lt.s32.totalorder %s2907_s24, 2 }
  0x78   : > { %s3146_s30 = sand.u32 1, %s2903_s23   ;;  %p3148_p5 = por %p331_p0, %p55_p1 }
  0x79   : > { %s461_s19 = sand.u32 1, %s2907_s24   ;;  %p3153_p9 = pnand %p2453_p2, %p51_p10 }
  0x7a   : > { %s3661_s17 = scalar_select %p3148_p5, 1, 0 }
  0x7b   : > { %s3663_s29 = scalar_select %p3153_p9, 1, 0 }
  0x7c   : > { %3662 = sst [smem:[#allocation32_spill]] %s3661_s17  ;;  %s2178_s13 = sshll.u32 %s2907_s24, 4 }
  0x7d   : > { %s3664_s2 = sld [smem:[#allocation34_spill]]  ;;  %s464_s18 = scalar_lea.vmem [#allocation5], %s3146_s30 }
  0x7e   : > { %s471_s6 = sshll.u32 %s464_s18, 4  ;;  %s3167_s23 = scalar_lea.hbm %s3605_s3, %s2178_s13  ;;  %s3169_s6 = int_to_ptr.vmem [resolvable:$true] %s471_s6 }
  0x7f   : > { %s3171_s20 = scalar_lea.sflag [#allocation6], %s461_s19  ;;  %p3177_p4 = pneg %p3153_p9 }
  0x81   : > { %s3665_s12 = scalar_select %p3177_p4, 1, 0 }
  0x83   : > { %s3161_s4 = scalar_lea.hbm %s3664_s2, %s2178_s13  ;;  %s2624_s8 = scalar_lea.hbm %s3664_s2, 32 }
  0x84   : > { %s2619_s17 = scalar_lea.hbm %s3161_s4, 16  ;;  %p2625_p10 = scmp.lt.u32.totalorder %s3161_s4, %s3664_s2 }
  0x85   : > { %p2620_p7 = scmp.ne.s32.totalorder %s3161_s4, %s2619_s17  ;;  %p2626_p11 = scmp.lt.u32.totalorder %s2624_s8, %s2619_s17 }
  0x86   : > { %p2628_p2 = scmp.lt.u32.totalorder %s2619_s17, %s3161_s4 }
  0x87   : > { %p2622_p1 = pnand %p3177_p4, %p2620_p7  ;;  %p2627_p0 = por %p2626_p11, %p2625_p10 }
  0x89   : > { %p2623_p3 = pneg %p2622_p1  ;;  %p2629_p5 = por %p2628_p2, %p2627_p0 }
  0x8b   : > { %p2630_p13 = pnand %p2629_p5, %p2623_p3 }
  0x8d   : > { %2633 = shalt.err (!%p2630_p13)
}
  0x8e   : > { %s2634_s19 = scalar_lea.vmem %s3169_s6, 16  ;;  %s2914_s1 = smov [#allocation5]  }
  0x8f   : > { %p2635_p7 = scmp.ne.s32.totalorder %s3169_s6, %s2634_s19  ;;  %s2639_s18 = sshll.u32 %s2914_s1, 4  ;;  %s2640_s18 = int_to_ptr.vmem [resolvable:$false] %s2639_s18 }
  0x90   : > { %s2641_s16 = scalar_lea.vmem %s2640_s18, 32  ;;  %p2642_p6 = scmp.lt.s32.totalorder %s3169_s6, %s2640_s18 }
  0x91   : > { %p2637_p1 = pnand %p2635_p7, %p3177_p4  ;;  %p2643_p8 = scmp.lt.s32.totalorder %s2641_s16, %s2634_s19 }
  0x93   : > { %p2638_p12 = pneg %p2637_p1  ;;  %p2644_p10 = por %p2643_p8, %p2642_p6 }
  0x95   : > { %p2645_p11 = pnand %p2644_p10, %p2638_p12 }
  0x97   : > { %2648 = shalt.err (!%p2645_p11)
}
  0x98   : > { %2438 = dma.hbm_to_vmem [thread:$0]  (!%p3153_p9), %s3161_s4, 16, %s3169_s6, %s3171_s20  }
  0x99   : > { %s2915_s17 = smov [#allocation10]   ;;  %s2916_s13 = smov [#allocation13]  }
  0x9a   : > { %s362_s8 = sshll.u32 %s2915_s17, 4  ;;  %s384_s2 = sshll.u32 %s2916_s13, 4  ;;  %s363_s8 = int_to_ptr.vmem [resolvable:$true] %s362_s8  ;;  %s385_s2 = int_to_ptr.vmem [resolvable:$true] %s384_s2 }
  0x9b   : > { %s2649_s18 = scalar_lea.hbm %s3607_s5, 128  ;;  %p3666_p8 = scmp.ne.s32.totalorder %s3652_s25, 0 }
  0x9c   : > { %p2650_p6 = scmp.ne.s32.totalorder %s3607_s5, %s2649_s18  ;;  %p2656_p5 = scmp.lt.u32.totalorder %s2649_s18, %s3607_s5 }
  0x9e   : > { %p2652_p12 = pnand %p2650_p6, %p3666_p8 }
  0xa0   : > { %p2653_p13 = pneg %p2652_p12 }
  0xa2   : > { %p2658_p3 = pnand %p2656_p5, %p2653_p13 }
  0xa4   : > { %2661 = shalt.err (!%p2658_p3)
}
  0xa5   : > { %s2662_s4 = scalar_lea.vmem %s363_s8, 128  ;;  %p2670_p1 = scmp.lt.s32.totalorder %s363_s8, %s363_s8 }
  0xa6   : > { %p2663_p0 = scmp.ne.s32.totalorder %s363_s8, %s2662_s4  ;;  %p2671_p10 = scmp.lt.s32.totalorder %s2662_s4, %s2662_s4 }
  0xa8   : > { %p2665_p2 = pnand %p2663_p0, %p3666_p8  ;;  %p2672_p11 = por %p2671_p10, %p2670_p1 }
  0xaa   : > { %p2666_p7 = pneg %p2665_p2 }
  0xac   : > { %p2673_p9 = pnand %p2672_p11, %p2666_p7 }
  0xae   : > { %2676 = shalt.err (!%p2673_p9)
}
  0xaf   : > { %p3667_p6 = scmp.ne.s32.totalorder %s3650_s15, 0  ;;  %s2677_s17 = scalar_lea.hbm %s3609_s7, 16 }
  0xb0   : > { %p2678_p12 = scmp.ne.s32.totalorder %s3609_s7, %s2677_s17  ;;  %p2684_p9 = scmp.lt.u32.totalorder %s2677_s17, %s3609_s7 }
  0xb1   : > { %2416 = dma.hbm_to_vmem [thread:$0]  (!%p3667_p6), %s3607_s5, 128, %s363_s8, [#allocation9]  }
  0xb2   : > { %p2680_p13 = pnand %p2678_p12, %p3666_p8 }
  0xb4   : > { %p2681_p5 = pneg %p2680_p13 }
  0xb6   : > { %p2686_p3 = pnand %p2684_p9, %p2681_p5 }
  0xb8   : > { %2689 = shalt.err (!%p2686_p3)
}
  0xb9   : > { %s2690_s16 = scalar_lea.vmem %s385_s2, 16  ;;  %s2697_s8 = scalar_lea.vmem %s385_s2, 32 }
  0xba   : > { %p2691_p0 = scmp.ne.s32.totalorder %s385_s2, %s2690_s16  ;;  %p2698_p1 = scmp.lt.s32.totalorder %s385_s2, %s385_s2 }
  0xbb   : > { %p2699_p10 = scmp.lt.s32.totalorder %s2697_s8, %s2690_s16 }
  0xbc   : > { %p2693_p2 = pnand %p2691_p0, %p3666_p8 }
  0xbd   : > { %p2700_p11 = por %p2699_p10, %p2698_p1 }
  0xbe   : > { %p2694_p7 = pneg %p2693_p2 }
  0xc0   : > { %p2701_p4 = pnand %p2700_p11, %p2694_p7 }
  0xc2   : > { %2704 = shalt.err (!%p2701_p4)
}
  0xc3   : > { %2422 = dma.hbm_to_vmem [thread:$0]  (!%p3667_p6), %s3609_s7, 16, %s385_s2, [#allocation12]  }
  0xc4   : > { %s2917_s21 = smov [#allocation16]   ;;  %s2918_s26 = smov [#allocation17]  }
  0xc5   : > { %s410_s9 = sshll.u32 %s2917_s21, 4  ;;  %s423_s17 = sshll.u32 %s2918_s26, 4  ;;  %s411_s9 = int_to_ptr.vmem [resolvable:$true] %s410_s9  ;;  %s424_s17 = int_to_ptr.vmem [resolvable:$true] %s423_s17 }
  0xc6   : > { %s2705_s18 = scalar_lea.hbm %s3612_s10, 512 }
  0xc7   : > { %p2706_p4 = scmp.ne.s32.totalorder %s3612_s10, %s2705_s18  ;;  %p2712_p5 = scmp.lt.u32.totalorder %s2705_s18, %s3612_s10 }
  0xc9   : > { %p2708_p12 = pnand %p2706_p4, %p3666_p8 }
  0xcb   : > { %p2709_p13 = pneg %p2708_p12 }
  0xcd   : > { %p2714_p9 = pnand %p2712_p5, %p2709_p13 }
  0xcf   : > { %2717 = shalt.err (!%p2714_p9)
}
  0xd0   : > { %s2718_s2 = scalar_lea.vmem %s411_s9, 512  ;;  %p2726_p7 = scmp.lt.s32.totalorder %s411_s9, %s411_s9 }
  0xd1   : > { %p2719_p3 = scmp.ne.s32.totalorder %s411_s9, %s2718_s2  ;;  %p2727_p1 = scmp.lt.s32.totalorder %s2718_s2, %s2718_s2 }
  0xd3   : > { %p2721_p0 = pnand %p2719_p3, %p3666_p8  ;;  %p2728_p10 = por %p2727_p1, %p2726_p7 }
  0xd5   : > { %p2722_p2 = pneg %p2721_p0 }
  0xd7   : > { %p2729_p11 = pnand %p2728_p10, %p2722_p2 }
  0xd9   : > { %2732 = shalt.err (!%p2729_p11)
}
  0xda   : > { %s3668_s6 = smov 8   ;;  %s3669_s21 = smov 128  }
  0xdb   : > { %2428 = dma.hbm_to_vmem [thread:$0]  (!%p3667_p6), %s3612_s10, 512, %s411_s9, [#allocation15], %s3669_s21, %s3669_s21, %s3668_s6  }
  0xdc   : > { %s2733_s19 = scalar_lea.hbm %s3613_s11, 512 }
  0xdd   : > { %p2734_p4 = scmp.ne.s32.totalorder %s3613_s11, %s2733_s19  ;;  %p2740_p5 = scmp.lt.u32.totalorder %s2733_s19, %s3613_s11 }
  0xdf   : > { %p2736_p12 = pnand %p2734_p4, %p3666_p8 }
  0xe1   : > { %p2737_p13 = pneg %p2736_p12 }
  0xe3   : > { %p2742_p9 = pnand %p2740_p5, %p2737_p13 }
  0xe5   : > { %2745 = shalt.err (!%p2742_p9)
}
  0xe6   : > { %s2746_s26 = scalar_lea.vmem %s424_s17, 512  ;;  %p2754_p7 = scmp.lt.s32.totalorder %s424_s17, %s424_s17 }
  0xe7   : > { %p2747_p3 = scmp.ne.s32.totalorder %s424_s17, %s2746_s26  ;;  %p2755_p1 = scmp.lt.s32.totalorder %s2746_s26, %s2746_s26 }
  0xe9   : > { %p2749_p0 = pnand %p2747_p3, %p3666_p8  ;;  %p2756_p10 = por %p2755_p1, %p2754_p7 }
  0xeb   : > { %p2750_p2 = pneg %p2749_p0 }
  0xed   : > { %p2757_p11 = pnand %p2756_p10, %p2750_p2 }
  0xef   : > { %2760 = shalt.err (!%p2757_p11)
}
  0xf0   : > { %2431 = dma.hbm_to_vmem [thread:$0]  (!%p3667_p6), %s3613_s11, 512, %s424_s17, [#allocation18], %s3669_s21, %s3669_s21, %s3668_s6  }
  0xf1   : > { %s2176_s25 = sshll.u32 %s3146_s30, 3  ;;  %s2177_s1 = sshll.u32 %s2907_s24, 7 }
  0xf2   : > { %s3284_s16 = scalar_lea.hbm %s3602_s0, %s2177_s1  ;;  %s441_s15 = scalar_lea.vmem [#allocation2], %s2176_s25 }
  0xf3   : > { %s448_s8 = sshll.u32 %s441_s15, 4  ;;  %s481_s4 = scalar_lea.vmem [#allocation7], %s3146_s30  ;;  %s3286_s8 = int_to_ptr.vmem [resolvable:$true] %s448_s8 }
  0xf4   : > { %s3289_s2 = sshll.u32 %s481_s4, 4  ;;  %s438_s26 = scalar_lea.sflag [#allocation3], %s3146_s30  ;;  %s489_s2 = int_to_ptr.vmem [resolvable:$true] %s3289_s2 }
  0xf5   : > { %s2761_s17 = scalar_lea.hbm %s3284_s16, 128  ;;  %p3670_p6 = scmp.ne.s32.totalorder %s3665_s12, 0 }
  0xf6   : > { %p2762_p8 = scmp.ne.s32.totalorder %s3284_s16, %s2761_s17  ;;  %s2766_s9 = scalar_lea.hbm %s3602_s0, 256 }
  0xf7   : > { %p2767_p13 = scmp.lt.u32.totalorder %s3284_s16, %s3602_s0  ;;  %p2768_p5 = scmp.lt.u32.totalorder %s2766_s9, %s2761_s17 }
  0xf8   : > { %p2764_p4 = pnand %p2762_p8, %p3670_p6  ;;  %p2770_p3 = scmp.lt.u32.totalorder %s2761_s17, %s3284_s16 }
  0xf9   : > { %p2769_p9 = por %p2768_p5, %p2767_p13 }
  0xfa   : > { %p2765_p12 = pneg %p2764_p4 }
  0xfb   : > { %p2771_p0 = por %p2770_p3, %p2769_p9 }
  0xfd   : > { %p2772_p2 = pnand %p2771_p0, %p2765_p12 }
  0xff   : > { %2775 = shalt.err (!%p2772_p2)
}
 0x100   : > { %s2776_s30 = scalar_lea.vmem %s3286_s8, 128  ;;  %s2919_s25 = smov [#allocation2]  }
 0x101   : > { %p2777_p7 = scmp.ne.s32.totalorder %s3286_s8, %s2776_s30  ;;  %s2781_s18 = sshll.u32 %s2919_s25, 4  ;;  %s2782_s18 = int_to_ptr.vmem [resolvable:$false] %s2781_s18 }
 0x102   : > { %s2783_s19 = scalar_lea.vmem %s2782_s18, 256  ;;  %p2784_p11 = scmp.lt.s32.totalorder %s3286_s8, %s2782_s18 }
 0x103   : > { %p2779_p1 = pnand %p2777_p7, %p3670_p6  ;;  %p2785_p8 = scmp.lt.s32.totalorder %s2783_s19, %s2776_s30 }
 0x105   : > { %p2780_p10 = pneg %p2779_p1  ;;  %p2786_p4 = por %p2785_p8, %p2784_p11 }
 0x107   : > { %p2787_p13 = pnand %p2786_p4, %p2780_p10 }
 0x109   : > { %2790 = shalt.err (!%p2787_p13)
}
 0x10a   : > { %p3671_p12 = scmp.ne.s32.totalorder %s3663_s29, 0  ;;  %s2791_s15 = scalar_lea.hbm %s3167_s23, 16 }
 0x10b   : > { %p2792_p5 = scmp.ne.s32.totalorder %s3167_s23, %s2791_s15  ;;  %s2796_s6 = scalar_lea.hbm %s3605_s3, 32 }
 0x10c   : > { %2435 = dma.hbm_to_vmem [thread:$0]  (!%p3671_p12), %s3284_s16, 128, %s3286_s8, %s438_s26  }
 0x10d   : > { %p2794_p9 = pnand %p2792_p5, %p3670_p6  ;;  %p2797_p0 = scmp.lt.u32.totalorder %s3167_s23, %s3605_s3 }
 0x10e   : > { %p2798_p2 = scmp.lt.u32.totalorder %s2796_s6, %s2791_s15  ;;  %p2800_p1 = scmp.lt.u32.totalorder %s2791_s15, %s3167_s23 }
 0x10f   : > { %p2795_p3 = pneg %p2794_p9 }
 0x110   : > { %p2799_p7 = por %p2798_p2, %p2797_p0 }
 0x112   : > { %p2801_p10 = por %p2800_p1, %p2799_p7 }
 0x114   : > { %p2802_p11 = pnand %p2801_p10, %p2795_p3 }
 0x116   : > { %2805 = shalt.err (!%p2802_p11)
}
 0x117   : > { %s2806_s16 = scalar_lea.vmem %s489_s2, 16  ;;  %s2920_s8 = smov [#allocation7]  }
 0x118   : > { %p2807_p8 = scmp.ne.s32.totalorder %s489_s2, %s2806_s16  ;;  %s2811_s26 = sshll.u32 %s2920_s8, 4  ;;  %s2812_s26 = int_to_ptr.vmem [resolvable:$false] %s2811_s26 }
 0x119   : > { %s2813_s13 = scalar_lea.vmem %s2812_s26, 32  ;;  %p2814_p5 = scmp.lt.s32.totalorder %s489_s2, %s2812_s26 }
 0x11a   : > { %p2809_p4 = pnand %p2807_p8, %p3670_p6  ;;  %p2815_p9 = scmp.lt.s32.totalorder %s2813_s13, %s2806_s16 }
 0x11c   : > { %p2810_p13 = pneg %p2809_p4  ;;  %p2816_p12 = por %p2815_p9, %p2814_p5 }
 0x11e   : > { %p2817_p0 = pnand %p2816_p12, %p2810_p13 }
 0x120   : > { %2820 = shalt.err (!%p2817_p0)
}
 0x121   : > { %p3672_p2 = scmp.ne.s32.totalorder %s3663_s29, 0  ;;  %p3673_p3 = scmp.ne.s32.totalorder %s3649_s28, 0 }
 0x122   : > { %s3335_s12 = sand.u32 (!%p3673_p3), 1, %s2899_s22   ;;  %p3674_p6 = scmp.ne.s32.totalorder (!%p3673_p3), %s3658_s14, 0 }
 0x123   : > { %2441 = dma.hbm_to_vmem [thread:$0]  (!%p3672_p2), %s3167_s23, 16, %s489_s2, %s3171_s20  }
 0x124   : > { %497 = sbr.rel (%p3673_p3) target bundleno = 2910 (0xb5e), region = 68  ;;  %s2181_s1 = sshll.u32 (!%p3673_p3), %s3335_s12, 3 }
 0x125   : > { %s500_s30 = scalar_lea.sflag (!%p3673_p3), [#allocation3], %s3335_s12  ;;  %s503_s25 = scalar_lea.vmem (!%p3673_p3), [#allocation2], %s2181_s1 }
 0x12b   : > { %2866 = dma.done.wait (%p3674_p6), %s500_s30, 128  }
 0x12c   : > { %2868 = vsyncadd (%p3674_p6), %s500_s30, 4294967168  ;;  %s508_s23 = sand.u32 1, %s3022_s27   ;;  %s511_s20 = scalar_lea.vmem [#allocation5], %s3335_s12 }
 0x12d   : > { %s509_s28 = scalar_lea.sflag [#allocation6], %s508_s23 }
 0x12e   : > { %2870 = dma.done.wait (%p3674_p6), %s509_s28, 32  }
 0x12f   : > { %2872 = vsyncadd (%p3674_p6), %s509_s28, 4294967264  ;;  %s519_s29 = scalar_lea.vmem [#allocation7], %s3335_s12  ;;  %p3675_p12 = scmp.eq.s32.totalorder %s3022_s27, 0 }
 0x131   : > { %2874 = dma.done.wait (%p3675_p12), [#allocation9], 256   ;;  %p3676_p7 = pmov %p3675_p12 }
 0x133   : > { %2876 = vsyncadd (%p3676_p7), [#allocation9], 4294967040  ;;  %p3677_p1 = pmov %p3676_p7 }
 0x135   : > { %2878 = dma.done.wait (%p3677_p1), [#allocation12], 32   ;;  %p3678_p10 = pmov %p3677_p1 }
 0x136   : > { %p3679_p11 = pmov %p3677_p1 }
 0x137   : > { %2880 = vsyncadd (%p3678_p10), [#allocation12], 4294967264 }
 0x138   : > { %2882 = dma.done.wait (%p3679_p11), [#allocation15], 1024   ;;  %p3680_p8 = pmov %p3677_p1 }
 0x139   : > { %p3681_p4 = pmov %p3677_p1 }
 0x13a   : > { %2884 = vsyncadd (%p3680_p8), [#allocation15], 4294966272 }
 0x13b   : > { %2886 = dma.done.wait (%p3681_p4), [#allocation18], 512   ;;  %p3682_p13 = pmov %p3677_p1 }
 0x13c   : > { %vm605_vm0 = vcmask 261120   ;;  %v3368_v0 = vld [vmem:[%s503_s25] sm:$0xff]  ;;  %v651_v8 = vld [vmem:[#allocation14 + $0x8] sm:$0xff]  ;;  %s3683_s18 = sld [smem:[#allocation38_spill]]  ;;  %v652_v12 = vld [vmem:[#allocation14 + $0x10] sm:$0xff]  ;;  %v2921_v13 = vmov 0.0|0.0  }
 0x13d   : > { %2888 = vsyncadd (%p3682_p13), [#allocation18], 4294966784  ;;  %v606_v1 = vsel %vm605_vm0, %v3368_v0, 0.0  ;;  %v650_v7 = vld [vmem:[#allocation14] sm:$0xff]  ;;  %2350 = vmatprep.subr.bf16.mxu0 %v2921_v13  ;;  %2356 = vmatprep.subr.bf16.mxu1 %v2921_v13  ;;  %v653_v15 = vld [vmem:[#allocation14 + $0x18] sm:$0xff]  ;;  %vm2922_vm1 = vmmov 0  }
 0x13e   : > { %607 = vadd.xlane.f32.xlu0 %v606_v1  ;;  %v2351_v9 = vpack.c.bf16 %v651_v8, %v650_v7  ;;  %v2354_v18 = vpack.c.bf16 %v653_v15, %v652_v12  ;;  %v2923_v19 = vmov 0.0   ;;  %p599_p5 = scmp.lt.s32.totalorder %s3022_s27, 1  ;;  %v2190_v25 = vld [vmem:[#allocation11] ss:$0 sm:$0xff]  ;;  %s3684_s26 = sld [smem:[#allocation33_spill]]  ;;  %v801_v31 = vld [vmem:[#allocation16] sm:$0xff] }
 0x13f   : > { %2265 = vmatprep.mubr.msk.f32.mxu0 %vm2922_vm1, %v2923_v19  ;;  %2276 = vmatprep.mubr.msk.f32.mxu1 %vm2922_vm1, %v2923_v19  ;;  %v2191_v27 = vld [vmem:[#allocation13] ss:$0 sm:$0xff]  ;;  %v802_v32 = vld [vmem:[#allocation16 + $0x8] sm:$0xff]  ;;  %v2193_v33 = vld [vmem:[%s511_s20] ss:$0 sm:$0xff]  ;;  %s2924_s30 = smov 4  }
 0x140   : > { %2352 = vmatpush3.bf16.msra.mxu0 %v2351_v9  ;;  %s600_s9 = scalar_select %p599_p5, %s3022_s27, 1  ;;  %v2363_v35 = vpack.c.bf16 %v802_v32, %v801_v31  ;;  %v803_v37 = vld [vmem:[#allocation16 + $0x10] sm:$0xff]  ;;  %v804_v38 = vld [vmem:[#allocation16 + $0x18] sm:$0xff]  ;;  %vm886_vm2 = vcmask 31744   ;;  %vm904_vm3 = vcmask 64512  }
 0x141   : > { %2353 = vmatprep.subr.bf16.mxu0 %v2921_v13  ;;  %v2366_v39 = vpack.c.bf16 %v804_v38, %v803_v37  ;;  %s2925_s25 = smov 124   ;;  %s2926_s23 = smov 116   ;;  %v3430_v48 = vld [vmem:[#allocation8] sm:$0xff]  ;;  %v3434_v50 = vld [vmem:[#allocation10] sm:$0xff] }
 0x142   : > { %v727_v10 = vld [vmem:[%s3683_s18] sm:$0xff]  ;;  %v728_v11 = vld [vmem:[%s3683_s18 + $0x8] sm:$0xff]  ;;  %v729_v16 = vld [vmem:[%s3683_s18 + $0x10] sm:$0xff]  ;;  %s2927_s28 = smov 8   ;;  %s2928_s20 = smov 120  }
 0x143   : > { %v2357_v14 = vpack.c.bf16 %v728_v11, %v727_v10  ;;  %v730_v17 = vld [vmem:[%s3683_s18 + $0x18] sm:$0xff]  ;;  %s2929_s14 = smov 108   ;;  %s2930_s2 = smov 16  }
 0x144   : > { %v2360_v20 = vpack.c.bf16 %v730_v17, %v729_v16  ;;  %2355 = vmatpush3.bf16.msra.mxu0 %v2354_v18  ;;  %s601_s13 = scalar_lea.vmem %s3684_s26, %s600_s9  ;;  %s2931_s19 = smov 112  }
 0x145   : > { %2358 = vmatpush3.bf16.msra.mxu1 %v2357_v14  ;;  %2362 = vmatprep.subr.bf16.mxu0 %v2921_v13  ;;  %v2192_v29 = vld [vmem:[%s601_s13] ss:$0 sm:$0xff]  ;;  %s2932_s15 = smov 100   ;;  %s2933_s4 = smov 24  }
 0x146   : > { %2359 = vmatprep.subr.bf16.mxu1 %v2921_v13  ;;  %s2934_s17 = smov 104   ;;  %s3685_s6 = sld [smem:[#allocation31_spill]] }
 0x147   : > { %s2215_s21 = sshll.u32 %s3022_s27, 7  ;;  %s598_s9 = scalar_lea.vmem [#allocation19], %s2181_s1 }
 0x148   : > { %s1983_s16 = sshll.u32 %s598_s9, 4  ;;  %s3686_s13 = sld [smem:[#allocation39_spill]]  ;;  %s3559_s16 = int_to_ptr.vmem [resolvable:$true] %s1983_s16 }
 0x149   : > { %2361 = vmatpush3.bf16.msra.mxu1 %v2360_v20  ;;  %s1970_s27 = scalar_lea.sflag [#allocation4], %s3335_s12  ;;  %s2935_s1 = smov [#allocation19]  }
 0x14a   : > { %2290 = vmatprep.subr.mxu1 %v2923_v19 }
 0x14c   : > { %p3687_p0 = scmp.ne.s32.totalorder %s3685_s6, 0 }
 0x1cb   : > { %v608_v2 = vpop.xlane.xlu0 %607 }
 0x1cc   : > { %v610_v3 = vmul.f32 0.03125, %v608_v2 }
 0x1ce   : > { %v611_v4 = vsub.f32 %v3368_v0, %v610_v3 }
 0x1d0   : > { %v612_v5 = vmul.f32 %v611_v4, %v611_v4 }
 0x1d2   : > { %v613_v6 = vsel %vm605_vm0, %v612_v5, 0.0 }
 0x1d3   : > { %614 = vadd.xlane.f32.xlu0 %v613_v6 }
 0x260   : > { %v615_v21 = vpop.xlane.xlu0 %614 }
 0x261   : > { %v616_v22 = vmul.f32 0.03125, %v615_v21 }
 0x263   : > { %v617_v23 = vadd.f32 1e-05, %v616_v22 }
 0x265   : > { %2517 = vrsqrt.f32 %v617_v23 }
 0x26f   : > { %v2518_v24 = vpop.eup %2517 }
 0x270   : > { %v619_v26 = vmul.f32 %v2518_v24, %v611_v4 }
 0x272   : > { %v626_v28 = vmul.f32 %v2190_v25, %v619_v26 }
 0x274   : > { %v633_v30 = vadd.f32 %v2191_v27, %v626_v28 }
 0x276   : > { %v641_v34 = vmul.f32 %v2192_v29, %v633_v30 }
 0x278   : > { %v649_v36 = vadd.f32 %v2193_v33, %v641_v34 }
 0x27a   : > { %2266 = vmatmul.mubr.msk.f32.vlgmr.msra.gmra.mrb[0].mxu0 %vm605_vm0, %v649_v36  ;;  %2277 = vmatmul.mubr.msk.f32.vlgmr.msra.gmra.mrb[0].mxu1 %vm605_vm0, %v649_v36 }
 0x27b   : > { %2364 = vmatpush3.bf16.msra.mxu0 %v2363_v35  ;;  %2287 = vmatprep.mubr.msk.f32.mxu0 %vm2922_vm1, %v2923_v19 }
 0x27c   : > { %2365 = vmatprep.subr.bf16.mxu0 %v2921_v13  ;;  %2292 = vmatprep.mubr.msk.f32.mxu1 %vm2922_vm1, %v2923_v19 }
 0x27f   : > { %2367 = vmatpush3.bf16.msra.mxu0 %v2366_v39 }
 0x280   : > { %2310 = vmatprep.subr.mxu0 %v2923_v19 }
 0x282   : > { %2288 = vmatmul.mubr.msk.f32.vlgmr.msra.gmra.mrb[2].mxu0 %vm605_vm0, %v649_v36 }
 0x283   : > { %2312 = vmatprep.mubr.msk.f32.mxu0 %vm2922_vm1, %v2923_v19 }
 0x34d   : > { %v3408_v40 = vpop.f32.mrb[0].mxu0  ;;  %v3410_v41 = vpop.f32.mrb[0].mxu1 }
 0x34e   : > { %897 = vrot.lane.b32.xlu1 %v3410_v41, %s2924_s30  ;;  %v2267_v42 = vpop.f32.mrb[1].mxu0  ;;  %v2278_v43 = vpop.f32.mrb[1].mxu1  ;;  %v3414_v44 = vsub.f32 0.0, %v3408_v40  ;;  %v3418_v45 = vsub.f32 0.0, %v3410_v41  ;;  %v901_v53 = vmul.f32 %v3430_v48, %v3410_v41  ;;  %v888_v59 = vmul.f32 %v3430_v48, %v3408_v40 }
 0x350   : > { %879 = vrot.lane.b32.xlu0 %v3414_v44, %s2925_s25 }
 0x352   : > { %893 = vrot.lane.b32.xlu1 %v3418_v45, %s2925_s25 }
 0x355   : > { %v3421_v46 = vpop.f32.mrb[2].mxu0 }
 0x356   : > { %v2289_v47 = vpop.f32.mrb[3].mxu0  ;;  %883 = vrot.lane.b32.xlu1 %v3408_v40, %s2924_s30  ;;  %s3557_s30 = scalar_lea.hbm %s3686_s13, %s2215_s21 }
 0x35a   : > { %1087 = vrot.lane.b32.xlu1 %v3410_v41, %s2925_s25 }
 0x35e   : > { %1084 = vrot.lane.b32.xlu1 %v3418_v45, %s2926_s23 }
 0x362   : > { %1066 = vrot.lane.b32.xlu1 %v3414_v44, %s2926_s23 }
 0x366   : > { %1069 = vrot.lane.b32.xlu1 %v3408_v40, %s2925_s25  ;;  %s2825_s25 = sshll.u32 %s2935_s1, 4  ;;  %s2826_s25 = int_to_ptr.vmem [resolvable:$false] %s2825_s25 }
 0x367   : > { %p2828_p6 = scmp.lt.s32.totalorder %s3559_s16, %s2826_s25 }
 0x36a   : > { %1074 = vrot.lane.b32.xlu1 %v3430_v48, %s2927_s28 }
 0x3c0   : > { %v898_v49 = vpop.permute.xlu1 %897 }
 0x3c2   : > { %v880_v55 = vpop.permute.xlu0 %879 }
 0x3c4   : > { %v894_v51 = vpop.permute.xlu1 %893 }
 0x3c5   : > { %v900_v52 = vsel %vm886_vm2, %v894_v51, %v898_v49 }
 0x3c6   : > { %v902_v54 = vmul.f32 %v900_v52, %v3434_v50 }
 0x3c8   : > { %v903_v56 = vadd.f32 %v902_v54, %v901_v53  ;;  %v884_v57 = vpop.permute.xlu1 %883 }
 0x3c9   : > { %v887_v58 = vsel %vm886_vm2, %v880_v55, %v884_v57 }
 0x3ca   : > { %v889_v60 = vmul.f32 %v887_v58, %v3434_v50  ;;  %2291 = vmatpush3.xpose.msk.msra.mxu1 %vm904_vm3, %v903_v56 }
 0x3cb   : > { %2295 = vmatprep.subr.mxu1 %v2923_v19 }
 0x3cc   : > { %v890_v61 = vadd.f32 %v889_v60, %v888_v59  ;;  %v1088_v62 = vpop.permute.xlu1 %1087 }
 0x3ce   : > { %2293 = vmatmul.mubr.msk.f32.vlgmr.msra.gmra.mrb[2].mxu1 %vm904_vm3, %v890_v61 }
 0x3cf   : > { %2296 = vmatpush3.msra.mxu1 %v3421_v46  ;;  %2297 = vmatprep.mubr.msk.f32.mxu1 %vm2922_vm1, %v2923_v19 }
 0x3d0   : > { %v1085_v63 = vpop.permute.xlu1 %1084  ;;  %2300 = vmatprep.subr.mxu1 %v2923_v19 }
 0x3d1   : > { %v1090_v1 = vsel %vm886_vm2, %v1085_v63, %v1088_v62 }
 0x3d2   : > { %v1092_v2 = vmul.f32 %v1090_v1, %v3434_v50 }
 0x3d4   : > { %v1067_v3 = vpop.permute.xlu1 %1066  ;;  %1094 = vrot.lane.b32.xlu0 %v1092_v2, %s2927_s28 }
 0x3d8   : > { %v1070_v4 = vpop.permute.xlu1 %1069 }
 0x3d9   : > { %v1072_v5 = vsel %vm886_vm2, %v1067_v3, %v1070_v4 }
 0x3da   : > { %v1078_v6 = vmul.f32 %v1072_v5, %v3434_v50 }
 0x3dc   : > { %1080 = vrot.lane.b32.xlu1 %v1078_v6, %s2927_s28  ;;  %v1075_v7 = vpop.permute.xlu1 %1074 }
 0x3dd   : > { %v1091_v8 = vmul.f32 %v1075_v7, %v3410_v41  ;;  %v1077_v11 = vmul.f32 %v1075_v7, %v3408_v40  ;;  %v1266_v7 = vld [vmem:[#allocation17 + $0x8] sm:$0xff] }
 0x3de   : > { %2311 = vmatpush3.msra.mxu0 %v1266_v7 }
 0x3df   : > { %2315 = vmatprep.subr.mxu0 %v2923_v19 }
 0x446   : > { %v1095_v9 = vpop.permute.xlu0 %1094 }
 0x447   : > { %v1097_v10 = vadd.f32 %v1095_v9, %v1091_v8 }
 0x449   : > { %1102 = vrot.lane.b32.xlu1 %v1097_v10, %s2928_s20 }
 0x44e   : > { %v1081_v12 = vpop.permute.xlu1 %1080 }
 0x44f   : > { %v1083_v13 = vadd.f32 %v1081_v12, %v1077_v11 }
 0x451   : > { %1099 = vrot.lane.b32.xlu1 %v1083_v13, %s2928_s20 }
 0x455   : > { %1430 = vrot.lane.b32.xlu1 %v3418_v45, %s2929_s14 }
 0x459   : > { %1433 = vrot.lane.b32.xlu1 %v3410_v41, %s2926_s23 }
 0x45d   : > { %1413 = vrot.lane.b32.xlu1 %v3414_v44, %s2929_s14 }
 0x461   : > { %1416 = vrot.lane.b32.xlu1 %v3408_v40, %s2926_s23  ;;  %s2827_s23 = scalar_lea.vmem %s2826_s25, 256 }
 0x465   : > { %1420 = vrot.lane.b32.xlu1 %v3430_v48, %s2930_s2 }
 0x4a1   : > { %v977_v14 = vpop.f32.mrb[2].mxu1 }
 0x4a2   : > { %v2294_v15 = vpop.f32.mrb[3].mxu1  ;;  %v981_v16 = vsel %vm904_vm3, %v977_v14, -inf }
 0x4a3   : > { %982 = vmax.xlane.f32.xlu0 %v981_v16 }
 0x4bb   : > { %v1103_v17 = vpop.permute.xlu1 %1102 }
 0x4c3   : > { %v1100_v18 = vpop.permute.xlu1 %1099 }
 0x4c7   : > { %v1431_v20 = vpop.permute.xlu1 %1430 }
 0x4cb   : > { %v1434_v21 = vpop.permute.xlu1 %1433 }
 0x4cc   : > { %v1436_v22 = vsel %vm886_vm2, %v1431_v20, %v1434_v21 }
 0x4cd   : > { %v1438_v23 = vmul.f32 %v1436_v22, %v3434_v50 }
 0x4cf   : > { %1440 = vrot.lane.b32.xlu1 %v1438_v23, %s2930_s2  ;;  %v1414_v24 = vpop.permute.xlu1 %1413 }
 0x4d3   : > { %v1417_v25 = vpop.permute.xlu1 %1416 }
 0x4d4   : > { %v1419_v26 = vsel %vm886_vm2, %v1414_v24, %v1417_v25 }
 0x4d5   : > { %v1424_v27 = vmul.f32 %v1419_v26, %v3434_v50 }
 0x4d7   : > { %1426 = vrot.lane.b32.xlu0 %v1424_v27, %s2930_s2  ;;  %v1421_v31 = vpop.permute.xlu1 %1420  ;;  %v1611_v27 = vld [vmem:[#allocation17 + $0x10] sm:$0xff] }
 0x4d8   : > { %v1437_v33 = vmul.f32 %v1421_v31, %v3410_v41  ;;  %v1423_v36 = vmul.f32 %v1421_v31, %v3408_v40 }
 0x4db   : > { %1189 = vrot.lane.b32.xlu0 %v3421_v46, %s2928_s20 }
 0x530   : > { %v983_v28 = vpop.xlane.xlu0 %982 }
 0x531   : > { %v984_v29 = vsub.f32 %v977_v14, %v983_v28 }
 0x533   : > { %v985_v30 = vmul.f32 1.442695, %v984_v29 }
 0x535   : > { %2519 = vpow2.f32 %v985_v30 }
 0x53f   : > { %v3474_v32 = vpop.eup %2519 }
 0x540   : > { %2298 = vmatmul.mubr.msk.f32.vlgmr.msra.gmra.mrb[4].mxu1 %vm904_vm3, %v3474_v32  ;;  %v987_v12 = vsel %vm904_vm3, %v3474_v32, 0.0 }
 0x541   : > { %2301 = vmatpush3.xpose.msk.msra.mxu1 %vm904_vm3, %v1103_v17  ;;  %v1441_v34 = vpop.permute.xlu1 %1440  ;;  %2302 = vmatprep.mubr.msk.f32.mxu1 %vm2922_vm1, %v2923_v19  ;;  %v1065_v17 = vld [vmem:[#allocation17] sm:$0xff] }
 0x542   : > { %v1443_v35 = vadd.f32 %v1441_v34, %v1437_v33  ;;  %2305 = vmatprep.subr.mxu1 %v2923_v19 }
 0x544   : > { %1448 = vrot.lane.b32.xlu0 %v1443_v35, %s2931_s19  ;;  %2303 = vmatmul.mubr.msk.f32.vlgmr.msra.gmra.mrb[6].mxu1 %vm904_vm3, %v1100_v18 }
 0x545   : > { %2307 = vmatprep.mubr.msk.f32.mxu1 %vm2922_vm1, %v2923_v19 }
 0x549   : > { %v1427_v37 = vpop.permute.xlu0 %1426 }
 0x54a   : > { %v1429_v38 = vadd.f32 %v1427_v37, %v1423_v36 }
 0x54c   : > { %1445 = vrot.lane.b32.xlu0 %v1429_v38, %s2931_s19 }
 0x54d   : > { %v1190_v39 = vpop.permute.xlu0 %1189 }
 0x54e   : > { %2306 = vmatpush3.msra.mxu1 %v1190_v39 }
 0x54f   : > { %2320 = vmatprep.subr.mxu1 %v2923_v19 }
 0x550   : > { %1703 = vrot.lane.b32.xlu0 %v3418_v45, %s2932_s15 }
 0x554   : > { %1706 = vrot.lane.b32.xlu0 %v3410_v41, %s2929_s14 }
 0x558   : > { %1689 = vrot.lane.b32.xlu0 %v3408_v40, %s2929_s14 }
 0x55c   : > { %1693 = vrot.lane.b32.xlu0 %v3430_v48, %s2933_s4 }
 0x5b6   : > { %v1449_v42 = vpop.permute.xlu0 %1448 }
 0x5be   : > { %v1446_v43 = vpop.permute.xlu0 %1445 }
 0x5c2   : > { %v1704_v47 = vpop.permute.xlu0 %1703 }
 0x5c6   : > { %v1707_v49 = vpop.permute.xlu0 %1706 }
 0x5c7   : > { %v1709_v51 = vsel %vm886_vm2, %v1704_v47, %v1707_v49  ;;  %v1884_v47 = vld [vmem:[#allocation17 + $0x18] sm:$0xff] }
 0x5c8   : > { %v1711_v52 = vmul.f32 %v1709_v51, %v3434_v50 }
 0x5ca   : > { %1713 = vrot.lane.b32.xlu0 %v1711_v52, %s2933_s4  ;;  %v1690_v57 = vpop.permute.xlu0 %1689 }
 0x5ce   : > { %v1694_v63 = vpop.permute.xlu0 %1693 }
 0x5cf   : > { %v1710_v2 = vmul.f32 %v1694_v63, %v3410_v41  ;;  %v1696_v41 = vmul.f32 %v1694_v63, %v3408_v40 }
 0x613   : > { %v3498_v53 = vpop.f32.mrb[4].mxu1 }
 0x614   : > { %v2299_v45 = vpop.f32.mrb[5].mxu1 }
 0x617   : > { %v1174_v54 = vpop.f32.mrb[6].mxu1 }
 0x618   : > { %v2304_v55 = vpop.f32.mrb[7].mxu1  ;;  %v1178_v56 = vsel %vm904_vm3, %v1174_v54, -inf }
 0x619   : > { %1179 = vmax.xlane.f32.xlu1 %v1178_v56 }
 0x62a   : > { %1686 = vrot.lane.b32.xlu1 %v3414_v44, %s2932_s15 }
 0x63c   : > { %v1714_v1 = vpop.permute.xlu0 %1713 }
 0x63d   : > { %v1716_v3 = vadd.f32 %v1714_v1, %v1710_v2 }
 0x6a6   : > { %v1180_v48 = vpop.xlane.xlu1 %1179 }
 0x6a7   : > { %v1181_v58 = vsub.f32 %v1174_v54, %v1180_v48  ;;  %v2213_v54 = vld [vmem:[%s519_s29] ss:$0 sm:$0xff]  ;;  %s2821_s29 = scalar_lea.vmem %s3559_s16, 128 }
 0x6a8   : > { %p2822_p9 = scmp.ne.s32.totalorder %s3559_s16, %s2821_s29  ;;  %p2829_p12 = scmp.lt.s32.totalorder %s2827_s23, %s2821_s29 }
 0x6a9   : > { %v1182_v59 = vmul.f32 1.442695, %v1181_v58 }
 0x6aa   : > { %v1687_v60 = vpop.permute.xlu1 %1686  ;;  %p2823_p2 = pnand %p2822_p9, %p3687_p0  ;;  %p2830_p7 = por %p2829_p12, %p2828_p6 }
 0x6ab   : > { %2521 = vpow2.f32 %v1182_v59  ;;  %v1692_v61 = vsel %vm886_vm2, %v1687_v60, %v1690_v57 }
 0x6ac   : > { %v1697_v62 = vmul.f32 %v1692_v61, %v3434_v50  ;;  %p2824_p3 = pneg %p2823_p2 }
 0x6ae   : > { %1699 = vrot.lane.b32.xlu0 %v1697_v62, %s2933_s4  ;;  %p2831_p1 = pnand %p2830_p7, %p2824_p3 }
 0x6b2   : > { %1534 = vrot.lane.b32.xlu0 %v3421_v46, %s2931_s19 }
 0x6b5   : > { %v2522_v44 = vpop.eup %2521 }
 0x6b6   : > { %2308 = vmatmul.mubr.msk.f32.vlgmr.msra.gmra.mrb[8].mxu1 %vm904_vm3, %v2522_v44  ;;  %1721 = vrot.lane.b32.xlu0 %v1716_v3, %s2934_s17  ;;  %v1184_v6 = vsel %vm904_vm3, %v2522_v44, 0.0 }
 0x6b7   : > { %2321 = vmatpush3.xpose.msk.msra.mxu1 %vm904_vm3, %v1449_v42  ;;  %2322 = vmatprep.mubr.msk.f32.mxu1 %vm2922_vm1, %v2923_v19 }
 0x6b8   : > { %2325 = vmatprep.subr.mxu1 %v2923_v19 }
 0x6ba   : > { %2323 = vmatmul.mubr.msk.f32.vlgmr.msra.gmra.mrb[10].mxu1 %vm904_vm3, %v1446_v43 }
 0x6bb   : > { %2327 = vmatprep.mubr.msk.f32.mxu1 %vm2922_vm1, %v2923_v19 }
 0x720   : > { %v1700_v50 = vpop.permute.xlu0 %1699 }
 0x721   : > { %v1702_v4 = vadd.f32 %v1700_v50, %v1696_v41 }
 0x723   : > { %1718 = vrot.lane.b32.xlu0 %v1702_v4, %s2934_s17 }
 0x724   : > { %v1535_v5 = vpop.permute.xlu0 %1534 }
 0x725   : > { %2326 = vmatpush3.msra.mxu1 %v1535_v5 }
 0x726   : > { %2335 = vmatprep.subr.mxu1 %v2923_v19 }
 0x728   : > { %v1722_v13 = vpop.permute.xlu0 %1721 }
 0x742   : > { %1185 = vadd.xlane.f32.xlu0 %v1184_v6 }
 0x758   : > { %1807 = vrot.lane.b32.xlu0 %v3421_v46, %s2934_s17 }
 0x789   : > { %v1261_v8 = vpop.f32.mrb[8].mxu1 }
 0x78a   : > { %v2309_v9 = vpop.f32.mrb[9].mxu1 }
 0x78d   : > { %v1520_v10 = vpop.f32.mrb[10].mxu1 }
 0x78e   : > { %v2324_v40 = vpop.f32.mrb[11].mxu1  ;;  %v1524_v11 = vsel %vm904_vm3, %v1520_v10, -inf }
 0x78f   : > { %1525 = vmax.xlane.f32.xlu1 %v1524_v11 }
 0x793   : > { %988 = vadd.xlane.f32.xlu1 %v987_v12 }
 0x795   : > { %v1719_v14 = vpop.permute.xlu0 %1718 }
 0x7cf   : > { %v1186_v15 = vpop.xlane.xlu0 %1185 }
 0x7d0   : > { %2523 = vrcp.f32 %v1186_v15 }
 0x7d3   : > { %v1808_v33 = vpop.permute.xlu0 %1807 }
 0x7da   : > { %v2524_v46 = vpop.eup %2523 }
 0x7db   : > { %v1265_v16 = vmul.f32 %v2524_v46, %v1261_v8 }
 0x7dd   : > { %2313 = vmatmul.mubr.msk.f32.vlgmr.msra.gmra.mrb[4].mxu0 %vm904_vm3, %v1265_v16 }
 0x7de   : > { %2316 = vmatpush3.msra.mxu0 %v1065_v17  ;;  %2317 = vmatprep.mubr.msk.f32.mxu0 %vm2922_vm1, %v2923_v19 }
 0x7df   : > { %2330 = vmatprep.subr.mxu0 %v2923_v19 }
 0x81c   : > { %v1526_v18 = vpop.xlane.xlu1 %1525 }
 0x81d   : > { %v1527_v20 = vsub.f32 %v1520_v10, %v1526_v18 }
 0x81f   : > { %v1528_v21 = vmul.f32 1.442695, %v1527_v20 }
 0x820   : > { %v989_v22 = vpop.xlane.xlu1 %988 }
 0x821   : > { %2525 = vpow2.f32 %v1528_v21 }
 0x822   : > { %2527 = vrcp.f32 %v989_v22 }
 0x82b   : > { %v2526_v23 = vpop.eup %2525 }
 0x82c   : > { %v2528_v24 = vpop.eup %2527  ;;  %2328 = vmatmul.mubr.msk.f32.vlgmr.msra.gmra.mrb[12].mxu1 %vm904_vm3, %v2526_v23  ;;  %v1530_v25 = vsel %vm904_vm3, %v2526_v23, 0.0 }
 0x82d   : > { %v1064_v26 = vmul.f32 %v2528_v24, %v3498_v53  ;;  %2336 = vmatpush3.xpose.msk.msra.mxu1 %vm904_vm3, %v1722_v13  ;;  %1531 = vadd.xlane.f32.xlu1 %v1530_v25 }
 0x82e   : > { %2337 = vmatprep.mubr.msk.f32.mxu1 %vm2922_vm1, %v2923_v19 }
 0x82f   : > { %2318 = vmatmul.mubr.msk.f32.vlgmr.msra.gmra.mrb[4].mxu0 %vm904_vm3, %v1064_v26 }
 0x830   : > { %2338 = vmatmul.mubr.msk.f32.vlgmr.msra.gmra.mrb[14].mxu1 %vm904_vm3, %v1719_v14  ;;  %2332 = vmatprep.mubr.msk.f32.mxu0 %vm2922_vm1, %v2923_v19 }
 0x831   : > { %2331 = vmatpush3.msra.mxu0 %v1611_v27 }
 0x832   : > { %2340 = vmatprep.subr.mxu0 %v2923_v19 }
 0x8ba   : > { %v1532_v28 = vpop.xlane.xlu1 %1531 }
 0x8bb   : > { %2529 = vrcp.f32 %v1532_v28 }
 0x8c5   : > { %v2530_v29 = vpop.eup %2529 }
 0x8ff   : > { %v1606_v30 = vpop.f32.mrb[12].mxu1 }
 0x900   : > { %v1610_v31 = vmul.f32 %v2530_v29, %v1606_v30  ;;  %v2329_v32 = vpop.f32.mrb[13].mxu1 }
 0x902   : > { %2333 = vmatmul.mubr.msk.f32.vlgmr.msra.gmra.mrb[4].mxu0 %vm904_vm3, %v1610_v31 }
 0x903   : > { %2341 = vmatpush3.msra.mxu0 %v1808_v33  ;;  %v1793_v34 = vpop.f32.mrb[14].mxu1  ;;  %2342 = vmatprep.mubr.msk.f32.mxu0 %vm2922_vm1, %v2923_v19 }
 0x904   : > { %v2339_v35 = vpop.f32.mrb[15].mxu1  ;;  %v1797_v36 = vsel %vm904_vm3, %v1793_v34, -inf  ;;  %2345 = vmatprep.subr.mxu0 %v2923_v19 }
 0x905   : > { %1798 = vmax.xlane.f32.xlu1 %v1797_v36 }
 0x992   : > { %v1799_v37 = vpop.xlane.xlu1 %1798 }
 0x993   : > { %v1800_v38 = vsub.f32 %v1793_v34, %v1799_v37 }
 0x995   : > { %v1801_v39 = vmul.f32 1.442695, %v1800_v38 }
 0x997   : > { %2531 = vpow2.f32 %v1801_v39 }
 0x9a1   : > { %v2532_v42 = vpop.eup %2531 }
 0x9a2   : > { %2343 = vmatmul.mubr.msk.f32.vlgmr.msra.gmra.mrb[6].mxu0 %vm904_vm3, %v2532_v42  ;;  %v1803_v43 = vsel %vm904_vm3, %v2532_v42, 0.0 }
 0x9a3   : > { %1804 = vadd.xlane.f32.xlu1 %v1803_v43  ;;  %2347 = vmatprep.mubr.msk.f32.mxu0 %vm2922_vm1, %v2923_v19 }
 0x9a4   : > { %2346 = vmatpush3.msra.mxu0 %v1884_v47 }
 0xa30   : > { %v1805_v49 = vpop.xlane.xlu1 %1804 }
 0xa31   : > { %2533 = vrcp.f32 %v1805_v49 }
 0xa3b   : > { %v2534_v51 = vpop.eup %2533 }
 0xa75   : > { %v1879_v52 = vpop.f32.mrb[6].mxu0 }
 0xa76   : > { %v1883_v53 = vmul.f32 %v2534_v51, %v1879_v52  ;;  %v2344_v45 = vpop.f32.mrb[7].mxu0 }
 0xa78   : > { %2348 = vmatmul.mubr.msk.f32.vlgmr.msra.gmra.mrb[4].mxu0 %vm904_vm3, %v1883_v53 }
 0xb4b   : > { %v1954_v55 = vpop.f32.mrb[4].mxu0 }
 0xb4c   : > { %v1966_v19 = vmul.f32 %v2213_v54, %v1954_v55  ;;  %v2349_v56 = vpop.f32.mrb[5].mxu0 }
 0xb4e   : > { %v1967_v48 = vadd.f32 %v1966_v19, %v3368_v0 }
 0xb50   : > { %1968 = vst.msk [vmem:[%s598_s9] sm:$0xff] %vm605_vm0, %v1967_v48 }
 0xb51   : > { %2834 = shalt.err (!%p2831_p1)
}
 0xb52   : > { %s2835_s12 = scalar_lea.hbm %s3557_s30, 128  ;;  %s2839_s14 = scalar_lea.hbm %s3686_s13, 256 }
 0xb53   : > { %p2836_p10 = scmp.ne.s32.totalorder %s3557_s30, %s2835_s12  ;;  %p2840_p4 = scmp.lt.u32.totalorder %s3557_s30, %s3686_s13 }
 0xb54   : > { %p2841_p13 = scmp.lt.u32.totalorder %s2839_s14, %s2835_s12  ;;  %p2843_p9 = scmp.lt.u32.totalorder %s2835_s12, %s3557_s30 }
 0xb55   : > { %p2837_p11 = pnand %p2836_p10, %p3687_p0 }
 0xb56   : > { %p2842_p5 = por %p2841_p13, %p2840_p4 }
 0xb57   : > { %p2838_p8 = pneg %p2837_p11 }
 0xb58   : > { %p2844_p2 = por %p2843_p9, %p2842_p5 }
 0xb5a   : > { %p2845_p3 = pnand %p2844_p2, %p2838_p8 }
 0xb5c   : > { %2848 = shalt.err (!%p2845_p3)
}
 0xb5d   : > { %2408 = dma.vmem_to_hbm [thread:$0]  (%p3687_p0), %s3559_s16, 128, %s3557_s30, %s1970_s27  }
 0xb5e PF: > { %s3688_s15 = sld [smem:[#allocation27_spill]]  ;;  %s3689_s4 = sld [smem:[#allocation32_spill]] }
 0xb5f   : > { %p3691_p12 = scmp.ge.s32.totalorder %s2907_s24, 2 }
 0xb64   : > { %s1995_s17 = sand.u32 1, %s3688_s15   ;;  %p3690_p6 = scmp.ne.s32.totalorder %s3689_s4, 0 }
 0xb65   : > { %s1996_s21 = scalar_lea.sflag [#allocation4], %s1995_s17 }
 0xb66   : > { %p2443_p7 = pnand %p3691_p12, %p3690_p6 }
 0xb68   : > { %2890 = dma.done.wait (!%p2443_p7), %s1996_s21, 128  }
 0xb69   : > { %2892 = vsyncadd (!%p2443_p7), %s1996_s21, 4294967168  ;;  %s3692_s24 = sld [smem:[#allocation29_spill]]  ;;  %s3693_s9 = sld [smem:[#allocation28_spill]] }
 0xb6a   : > { %s3694_s23 = sld [smem:[#allocation30_spill]]  ;;  %s3695_s21 = smov %s2899_s22 }
 0xb6f   : > { %p32_p1 = scmp.ge.s32.totalorder %s3692_s24, 4   ;;  %s3696_s22 = smov %s3693_s9 }
 0xb71   :  { %34 = sbr.rel (!%p32_p1) target bundleno = 19 (0x13), region = 168 }
 0xb78   :  { %2001 = vsyncpa [#allocation3], 1 }
 0xb79   :  { %2003 = vsyncpa [#allocation3 + $0x1], 1 }
 0xb7a   :  { %2004 = vsyncpa [#allocation6], 1 }
 0xb7b   :  { %2006 = vsyncpa [#allocation6 + $0x1], 1 }
 0xb7c   :  { %2007 = vsyncpa [#allocation9], 1 }
 0xb7d   :  { %2008 = vsyncpa [#allocation12], 1 }
 0xb7e   :  { %2009 = vsyncpa [#allocation15], 1 }
 0xb7f   :  { %2010 = vsyncpa [#allocation18], 1 }
 0xb80   :  { %2011 = vsyncpa [#allocation4], 1 }
 0xb81   :  { %2013 = vsyncpa [#allocation4 + $0x1], 1 }

</bundles_post_ra>
